<compile_context>
chip_gen: v7x
topology: tpu7x:2x2x1
jax: 0.10.0
libtpu: 0.0.40
codegen_flags: <defaults>
</compile_context>

<pallas_src>
import math
import functools

import numpy as np
import jax
import jax.numpy as jnp
from jax.experimental import pallas as pl
from jax.experimental.pallas import tpu as pltpu

MIN_BIN_WIDTH = 1e-3
MIN_BIN_HEIGHT = 1e-3
MIN_DERIVATIVE = 1e-3
SEARCH_EPS = 1e-6


def _softplus(x):
    return jnp.maximum(x, 0.0) + jnp.log(1.0 + jnp.exp(-jnp.abs(x)))


def round_up(x, m):
    return ((x + m - 1) // m) * m


def nsf_ar_kernel(K, B, d_pad, xt_ref, w1_ref, b1_ref, w2_ref, b2_ref,
                  w3_ref, b3_ref, z_ref, ld_ref):
    """All tensors are lane-dense with the batch tile on the last (lane) axis.

    xt_ref : (d_pad, TILE_N)      dim-major transposed input tile
    w1     : (d_pad*H, d_pad)     fused first-layer weights (AR zero masks)
    b1     : (d_pad*H, 1)
    w2     : (d_pad*H, d_pad*H)   block-diagonal second layer
    b2     : (d_pad*H, 1)
    w3     : (P*d_pad, d_pad*H)   row p*d_pad+i -> spline param p of dim i
    b3     : (P*d_pad, 1)         dim-0 rows carry init_param (weights zero)
    z_ref, ld_ref : (d_pad, TILE_N)
    """
    f32 = jnp.float32
    xt = xt_ref[...]                                   # (d_pad, TILE_N)

    # ---- fused autoregressive conditioner: 3 plain MXU matmuls ----
    h1 = jnp.tanh(jnp.dot(w1_ref[...], xt, preferred_element_type=f32)
                  + b1_ref[...])
    h2 = jnp.tanh(jnp.dot(w2_ref[...], h1, preferred_element_type=f32)
                  + b2_ref[...])
    params = (jnp.dot(w3_ref[...], h2, preferred_element_type=f32)
              + b3_ref[...])                           # (P*d_pad, TILE_N)

    def slab(p):                                       # aligned (d_pad, TILE_N)
        return params[p * d_pad:(p + 1) * d_pad, :]

    W_un = [slab(k) for k in range(K)]
    H_un = [slab(K + k) for k in range(K)]
    D_un = [slab(2 * K + k) for k in range(K - 1)]

    def softmax_slabs(xs):
        m = xs[0]
        for v in xs[1:]:
            m = jnp.maximum(m, v)
        es = [jnp.exp(v - m) for v in xs]
        s = es[0]
        for e in es[1:]:
            s = s + e
        inv = 1.0 / s
        return [e * inv for e in es]

    widths = [MIN_BIN_WIDTH + (1.0 - MIN_BIN_WIDTH * K) * w
              for w in softmax_slabs(W_un)]
    heights = [MIN_BIN_HEIGHT + (1.0 - MIN_BIN_HEIGHT * K) * h
               for h in softmax_slabs(H_un)]

    # upper bin edges via unrolled running sums; right edge forced exactly to B
    cw, ch = [], []
    aw, ah = widths[0], heights[0]
    cw.append(-B + 2.0 * B * aw)
    ch.append(-B + 2.0 * B * ah)
    for k in range(1, K):
        aw = aw + widths[k]
        ah = ah + heights[k]
        cw.append(-B + 2.0 * B * aw)
        ch.append(-B + 2.0 * B * ah)
    cw[K - 1] = jnp.full_like(xt, B)
    ch[K - 1] = jnp.full_like(xt, B)

    # interior knot derivatives; boundary knot derivative is exactly 1.0
    d_inner = [MIN_DERIVATIVE + _softplus(v) for v in D_un]

    inside = jnp.logical_and(xt >= -B, xt <= B)
    xin = jnp.clip(xt, -B, B)

    # searchsorted: number of upper edges passed (eps slack on the last edge)
    bin_idx = jnp.zeros(xt.shape, jnp.int32)
    for k in range(K - 1):
        bin_idx = bin_idx + (xin >= cw[k]).astype(jnp.int32)
    bin_idx = bin_idx + (xin >= (B + SEARCH_EPS)).astype(jnp.int32)
    bin_idx = jnp.clip(bin_idx, 0, K - 1)

    # gathers as unrolled selects over the K slabs
    upper_w, upper_h = cw[0], ch[0]
    for k in range(1, K):
        sel = bin_idx == k
        upper_w = jnp.where(sel, cw[k], upper_w)
        upper_h = jnp.where(sel, ch[k], upper_h)
    lower_w = jnp.full_like(xt, -B)
    lower_h = jnp.full_like(xt, -B)
    der_lo = jnp.ones_like(xt)
    der_hi = jnp.ones_like(xt)
    for k in range(K - 1):
        sel_next = bin_idx == (k + 1)
        lower_w = jnp.where(sel_next, cw[k], lower_w)
        lower_h = jnp.where(sel_next, ch[k], lower_h)
        der_lo = jnp.where(sel_next, d_inner[k], der_lo)
        der_hi = jnp.where(bin_idx == k, d_inner[k], der_hi)

    # monotonic rational-quadratic spline, forward
    bw = upper_w - lower_w
    hh = upper_h - lower_h
    inv_bw = 1.0 / bw
    delta = hh * inv_bw
    theta = (xin - lower_w) * inv_bw
    t1m = theta * (1.0 - theta)
    numerator = hh * (delta * theta * theta + der_lo * t1m)
    denominator = delta + (der_lo + der_hi - 2.0 * delta) * t1m
    inv_den = 1.0 / denominator
    out_in = lower_h + numerator * inv_den
    deriv_num = (delta * delta
                 * (der_hi * theta * theta
                    + 2.0 * delta * t1m
                    + der_lo * (1.0 - theta) * (1.0 - theta)))
    ld_in = jnp.log(deriv_num * inv_den * inv_den)     # single log

    z_ref[...] = jnp.where(inside, out_in, xt)
    ld_ref[...] = jnp.where(inside, ld_in, jnp.zeros_like(ld_in))


def make_nsf_ar_params(key, dim, K=5, hidden_dim=8):
    """Deterministic synthetic parameters (matching the module's shapes)."""
    P = 3 * K - 1
    keys = jax.random.split(key, 1 + 6 * max(dim - 1, 1))
    init_param = jax.random.uniform(keys[0], (P,), jnp.float32, -0.5, 0.5)
    per_layer = []
    kidx = 1
    for i in range(1, dim):
        k1, k2, k3, k4, k5, k6 = keys[kidx:kidx + 6]
        kidx += 6
        W1 = jax.random.normal(k1, (i, hidden_dim), jnp.float32) * 0.3
        B1 = jax.random.normal(k2, (hidden_dim,), jnp.float32) * 0.1
        W2 = jax.random.normal(k3, (hidden_dim, hidden_dim), jnp.float32) * 0.3
        B2 = jax.random.normal(k4, (hidden_dim,), jnp.float32) * 0.1
        W3 = jax.random.normal(k5, (hidden_dim, P), jnp.float32) * 0.3
        B3 = jax.random.normal(k6, (P,), jnp.float32) * 0.1
        per_layer.append((W1, B1, W2, B2, W3, B3))
    return dict(init_param=init_param, per_layer=per_layer)


def pack_nsf_ar_weights(params, dim, K=5, hidden_dim=8):
    """Fuse the per-dimension MLPs into block matrices for the kernel.

    Row p*d_pad + i of (W3f, B3f) produces spline parameter p of flow dim i,
    so `params[p*d_pad:(p+1)*d_pad, :]` is an aligned (d_pad, n) slab inside
    the kernel.  Dim 0 has zero weights and bias = init_param."""
    P = 3 * K - 1
    H = hidden_dim
    d_pad = round_up(dim, 8)
    W1f = np.zeros((d_pad * H, d_pad), np.float32)
    B1f = np.zeros((d_pad * H, 1), np.float32)
    W2f = np.zeros((d_pad * H, d_pad * H), np.float32)
    B2f = np.zeros((d_pad * H, 1), np.float32)
    W3f = np.zeros((P * d_pad, d_pad * H), np.float32)
    B3f = np.zeros((P * d_pad, 1), np.float32)
    init = np.asarray(params['init_param'], np.float32)
    B3f[0:P * d_pad:d_pad, 0] = init                   # dim 0 -> init_param
    for i in range(1, dim):
        W1, B1, W2, B2, W3, B3 = [np.asarray(a, np.float32)
                                  for a in params['per_layer'][i - 1]]
        W1f[i * H:(i + 1) * H, :i] = W1.T              # autoregressive mask
        B1f[i * H:(i + 1) * H, 0] = B1
        W2f[i * H:(i + 1) * H, i * H:(i + 1) * H] = W2.T
        B2f[i * H:(i + 1) * H, 0] = B2
        W3f[i:P * d_pad:d_pad, i * H:(i + 1) * H] = W3.T
        B3f[i:P * d_pad:d_pad, 0] = B3
    return d_pad, tuple(jnp.asarray(a) for a in (W1f, B1f, W2f, B2f, W3f, B3f))


def nsf_ar_forward(x, params, K=5, B=5.0, hidden_dim=8):
    n, d = x.shape
    d_pad, (W1f, B1f, W2f, B2f, W3f, B3f) = pack_nsf_ar_weights(
        params, d, K=K, hidden_dim=hidden_dim)

    n_pad = round_up(n, 128)
    tile_n = 128
    for t in (1024, 512, 256):          # largest lane tile dividing n_pad
        if n_pad % t == 0:
            tile_n = t
            break

    xt = jnp.zeros((d_pad, n_pad), jnp.float32)
    xt = xt.at[:d, :n].set(x.T.astype(jnp.float32))

    kernel = functools.partial(nsf_ar_kernel, K, float(B), d_pad)
    tile_spec = pl.BlockSpec((d_pad, tile_n), lambda j: (0, j))

    def resident(arr):                  # constant index_map: stays in VMEM
        return pl.BlockSpec(arr.shape, lambda j: (0, 0))

    z_full, ld_full = pl.pallas_call(
        kernel,
        out_shape=(jax.ShapeDtypeStruct((d_pad, n_pad), jnp.float32),
                   jax.ShapeDtypeStruct((d_pad, n_pad), jnp.float32)),
        grid=(n_pad // tile_n,),
        in_specs=[tile_spec, resident(W1f), resident(B1f), resident(W2f),
                  resident(B2f), resident(W3f), resident(B3f)],
        out_specs=(tile_spec, tile_spec),
        compiler_params=pltpu.CompilerParams(
            dimension_semantics=("parallel",),
            vmem_limit_bytes=64 * 1024 * 1024),
    )(xt, W1f, B1f, W2f, B2f, W3f, B3f)

    # replicate the module's zs.reshape((n, d)) / lds.reshape((n, d)).sum(1)
    # applied to the dim-major flat vectors (flat index = i*n + j).
    z_dn = z_full[:d, :n]
    ld_dn = ld_full[:d, :n]
    zs = z_dn.reshape(-1).reshape(n, d)
    log_det = ld_dn.reshape(-1).reshape(n, d).sum(axis=1)
    return zs, log_det


# -------------------- pure-JAX reference (for self-check) --------------------
def _ref_unconstrained_rqs_fwd(inputs, Wu, Hu, Du, B, K):
    inside = (inputs >= -B) & (inputs <= B)
    const = math.log(math.exp(1.0 - MIN_DERIVATIVE) - 1.0)
    m = Du.shape[0]
    Dpad = jnp.concatenate([jnp.full((m, 1), const), Du,
                            jnp.full((m, 1), const)], axis=1)
    widths = jax.nn.softmax(Wu, axis=-1)
    widths = MIN_BIN_WIDTH + (1 - MIN_BIN_WIDTH * K) * widths
    cumwidths = jnp.concatenate([jnp.zeros((m, 1)),
                                 jnp.cumsum(widths, axis=-1)], axis=-1)
    cumwidths = (2 * B * cumwidths - B).at[:, 0].set(-B).at[:, -1].set(B)
    widths = cumwidths[:, 1:] - cumwidths[:, :-1]
    derivatives = MIN_DERIVATIVE + jax.nn.softplus(Dpad)
    heights = jax.nn.softmax(Hu, axis=-1)
    heights = MIN_BIN_HEIGHT + (1 - MIN_BIN_HEIGHT * K) * heights
    cumheights = jnp.concatenate([jnp.zeros((m, 1)),
                                  jnp.cumsum(heights, axis=-1)], axis=-1)
    cumheights = (2 * B * cumheights - B).at[:, 0].set(-B).at[:, -1].set(B)
    heights = cumheights[:, 1:] - cumheights[:, :-1]
    xin = jnp.clip(inputs, -B, B)
    cw_cmp = cumwidths.at[:, -1].add(SEARCH_EPS)
    bin_idx = jnp.sum((xin[:, None] >= cw_cmp).astype(jnp.int32), axis=-1) - 1
    bin_idx = jnp.clip(bin_idx, 0, K - 1)
    take = lambda a: jnp.take_along_axis(a, bin_idx[:, None], axis=1)[:, 0]
    icw, ibw = take(cumwidths[:, :K]), take(widths)
    ich, ih = take(cumheights[:, :K]), take(heights)
    idelta = take(heights / widths)
    ider, iderp1 = take(derivatives[:, :K]), take(derivatives[:, 1:])
    theta = (xin - icw) / ibw
    t1m = theta * (1 - theta)
    numerator = ih * (idelta * theta ** 2 + ider * t1m)
    denominator = idelta + (ider + iderp1 - 2 * idelta) * t1m
    out = ich + numerator / denominator
    dnum = idelta ** 2 * (iderp1 * theta ** 2 + 2 * idelta * t1m
                          + ider * (1 - theta) ** 2)
    ld = jnp.log(dnum) - 2 * jnp.log(denominator)
    return jnp.where(inside, out, inputs), jnp.where(inside, ld, 0.0)


def nsf_ar_forward_ref(x, params, K=5, B=5.0):
    n, d = x.shape
    P = 3 * K - 1
    rows = [jnp.broadcast_to(params['init_param'][None, :], (n, P))]
    for i in range(1, d):
        W1, B1, W2, B2, W3, B3 = params['per_layer'][i - 1]
        h = jnp.tanh(x[:, :i] @ W1 + B1)
        h = jnp.tanh(h @ W2 + B2)
        rows.append(h @ W3 + B3)
    allp = jnp.concatenate(rows, axis=0)      # (n*d, P), dim-major row blocks
    Wu, Hu, Du = allp[:, :K], allp[:, K:2 * K], allp[:, 2 * K:]
    zf, ldf = _ref_unconstrained_rqs_fwd(x.T.reshape(-1), Wu, Hu, Du, B, K)
    return zf.reshape(n, d), ldf.reshape(n, d).sum(axis=1)


if __name__ == "__main__":
    key = jax.random.PRNGKey(0)
    K, B, hidden = 5, 5.0, 8

    # case 1: tiny shapes matching the module defaults
    n, d = 8, 4
    kx, kp, key = jax.random.split(key, 3)
    x = jax.random.normal(kx, (n, d), jnp.float32) * 3.0   # exercises tails too
    params = make_nsf_ar_params(kp, d, K=K, hidden_dim=hidden)
    zs, log_det = nsf_ar_forward(x, params, K=K, B=B, hidden_dim=hidden)
    jax.block_until_ready((zs, log_det))
    zs_ref, ld_ref = nsf_ar_forward_ref(x, params, K=K, B=B)
    assert zs.shape == (n, d) and log_det.shape == (n,)
    np.testing.assert_allclose(np.asarray(zs), np.asarray(zs_ref),
                               rtol=2e-3, atol=2e-3)
    np.testing.assert_allclose(np.asarray(log_det), np.asarray(ld_ref),
                               rtol=2e-3, atol=2e-3)

    # case 2: non-aligned n/d to exercise the batch grid + padding path
    n2, d2 = 300, 6
    kx2, kp2 = jax.random.split(key)
    x2 = jax.random.normal(kx2, (n2, d2), jnp.float32) * 3.0
    params2 = make_nsf_ar_params(kp2, d2, K=K, hidden_dim=hidden)
    zs2, log_det2 = nsf_ar_forward(x2, params2, K=K, B=B, hidden_dim=hidden)
    jax.block_until_ready((zs2, log_det2))
    zs2_ref, ld2_ref = nsf_ar_forward_ref(x2, params2, K=K, B=B)
    np.testing.assert_allclose(np.asarray(zs2), np.asarray(zs2_ref),
                               rtol=2e-3, atol=2e-3)
    np.testing.assert_allclose(np.asarray(log_det2), np.asarray(ld2_ref),
                               rtol=2e-3, atol=2e-3)

    print("KERNEL_OK")
</pallas_src>

<mosaic_0001>
module attributes {stable_mosaic.version = 11 : i64} {
  func.func @nsf_ar_kernel(%arg0: i32, %arg1: memref<8x128xf32, #tpu.memory_space<vmem>>, %arg2: memref<64x8xf32, #tpu.memory_space<vmem>>, %arg3: memref<64x1xf32, #tpu.memory_space<vmem>>, %arg4: memref<64x64xf32, #tpu.memory_space<vmem>>, %arg5: memref<64x1xf32, #tpu.memory_space<vmem>>, %arg6: memref<112x64xf32, #tpu.memory_space<vmem>>, %arg7: memref<112x1xf32, #tpu.memory_space<vmem>>, %arg8: memref<8x128xf32, #tpu.memory_space<vmem>>, %arg9: memref<8x128xf32, #tpu.memory_space<vmem>>) attributes {dimension_semantics = [#tpu.dimension_semantics<parallel>], iteration_bounds = array<i64: 1>, scalar_prefetch = 0 : i64, scratch_operands = 0 : i64, tpu.core_type = #tpu.core_type<tc>, window_params = [{transform_indices = @transform_0, window_bounds = array<i64: 8, 128>}, {pipeline_mode = #tpu.pipeline_mode<synchronous>, transform_indices = @transform_1, window_bounds = array<i64: 64, 8>}, {pipeline_mode = #tpu.pipeline_mode<synchronous>, transform_indices = @transform_2, window_bounds = array<i64: 64, 1>}, {pipeline_mode = #tpu.pipeline_mode<synchronous>, transform_indices = @transform_3, window_bounds = array<i64: 64, 64>}, {pipeline_mode = #tpu.pipeline_mode<synchronous>, transform_indices = @transform_4, window_bounds = array<i64: 64, 1>}, {pipeline_mode = #tpu.pipeline_mode<synchronous>, transform_indices = @transform_5, window_bounds = array<i64: 112, 64>}, {pipeline_mode = #tpu.pipeline_mode<synchronous>, transform_indices = @transform_6, window_bounds = array<i64: 112, 1>}, {transform_indices = @transform_7, window_bounds = array<i64: 8, 128>}, {transform_indices = @transform_8, window_bounds = array<i64: 8, 128>}]} {
    %c0 = arith.constant 0 : index
    %c0_0 = arith.constant 0 : index
    %0 = vector.load %arg1[%c0, %c0_0] : memref<8x128xf32, #tpu.memory_space<vmem>>, vector<8x128xf32>
    %c0_1 = arith.constant 0 : index
    %c0_2 = arith.constant 0 : index
    %1 = vector.load %arg2[%c0_1, %c0_2] : memref<64x8xf32, #tpu.memory_space<vmem>>, vector<64x8xf32>
    %cst = arith.constant dense<0.000000e+00> : vector<64x128xf32>
    %2 = tpu.matmul %1, %0, %cst {dimension_numbers = #tpu.dot_dimension_numbers<[1], [0], [0], [1], [0, 0, 1, 1], [], []>} : vector<64x8xf32>, vector<8x128xf32>, vector<64x128xf32> -> vector<64x128xf32>
    %c0_3 = arith.constant 0 : index
    %c0_4 = arith.constant 0 : index
    %3 = vector.load %arg3[%c0_3, %c0_4] : memref<64x1xf32, #tpu.memory_space<vmem>>, vector<64x1xf32>
    %4 = vector.broadcast %3 : vector<64x1xf32> to vector<64x128xf32>
    %5 = arith.addf %2, %4 : vector<64x128xf32>
    %6 = math.tanh %5 : vector<64x128xf32>
    %c0_5 = arith.constant 0 : index
    %c0_6 = arith.constant 0 : index
    %7 = vector.load %arg4[%c0_5, %c0_6] : memref<64x64xf32, #tpu.memory_space<vmem>>, vector<64x64xf32>
    %cst_7 = arith.constant dense<0.000000e+00> : vector<64x128xf32>
    %8 = tpu.matmul %7, %6, %cst_7 {dimension_numbers = #tpu.dot_dimension_numbers<[1], [0], [0], [1], [0, 0, 1, 1], [], []>} : vector<64x64xf32>, vector<64x128xf32>, vector<64x128xf32> -> vector<64x128xf32>
    %c0_8 = arith.constant 0 : index
    %c0_9 = arith.constant 0 : index
    %9 = vector.load %arg5[%c0_8, %c0_9] : memref<64x1xf32, #tpu.memory_space<vmem>>, vector<64x1xf32>
    %10 = vector.broadcast %9 : vector<64x1xf32> to vector<64x128xf32>
    %11 = arith.addf %8, %10 : vector<64x128xf32>
    %12 = math.tanh %11 : vector<64x128xf32>
    %c0_10 = arith.constant 0 : index
    %c0_11 = arith.constant 0 : index
    %13 = vector.load %arg6[%c0_10, %c0_11] : memref<112x64xf32, #tpu.memory_space<vmem>>, vector<112x64xf32>
    %cst_12 = arith.constant dense<0.000000e+00> : vector<112x128xf32>
    %14 = tpu.matmul %13, %12, %cst_12 {dimension_numbers = #tpu.dot_dimension_numbers<[1], [0], [0], [1], [0, 0, 1, 1], [], []>} : vector<112x64xf32>, vector<64x128xf32>, vector<112x128xf32> -> vector<112x128xf32>
    %c0_13 = arith.constant 0 : index
    %c0_14 = arith.constant 0 : index
    %15 = vector.load %arg7[%c0_13, %c0_14] : memref<112x1xf32, #tpu.memory_space<vmem>>, vector<112x1xf32>
    %16 = vector.broadcast %15 : vector<112x1xf32> to vector<112x128xf32>
    %17 = arith.addf %14, %16 : vector<112x128xf32>
    %18 = vector.extract_strided_slice %17 {offsets = [0, 0], sizes = [8, 128], strides = [1, 1]} : vector<112x128xf32> to vector<8x128xf32>
    %19 = vector.extract_strided_slice %17 {offsets = [8, 0], sizes = [8, 128], strides = [1, 1]} : vector<112x128xf32> to vector<8x128xf32>
    %20 = vector.extract_strided_slice %17 {offsets = [16, 0], sizes = [8, 128], strides = [1, 1]} : vector<112x128xf32> to vector<8x128xf32>
    %21 = vector.extract_strided_slice %17 {offsets = [24, 0], sizes = [8, 128], strides = [1, 1]} : vector<112x128xf32> to vector<8x128xf32>
    %22 = vector.extract_strided_slice %17 {offsets = [32, 0], sizes = [8, 128], strides = [1, 1]} : vector<112x128xf32> to vector<8x128xf32>
    %23 = vector.extract_strided_slice %17 {offsets = [40, 0], sizes = [8, 128], strides = [1, 1]} : vector<112x128xf32> to vector<8x128xf32>
    %24 = vector.extract_strided_slice %17 {offsets = [48, 0], sizes = [8, 128], strides = [1, 1]} : vector<112x128xf32> to vector<8x128xf32>
    %25 = vector.extract_strided_slice %17 {offsets = [56, 0], sizes = [8, 128], strides = [1, 1]} : vector<112x128xf32> to vector<8x128xf32>
    %26 = vector.extract_strided_slice %17 {offsets = [64, 0], sizes = [8, 128], strides = [1, 1]} : vector<112x128xf32> to vector<8x128xf32>
    %27 = vector.extract_strided_slice %17 {offsets = [72, 0], sizes = [8, 128], strides = [1, 1]} : vector<112x128xf32> to vector<8x128xf32>
    %28 = vector.extract_strided_slice %17 {offsets = [80, 0], sizes = [8, 128], strides = [1, 1]} : vector<112x128xf32> to vector<8x128xf32>
    %29 = vector.extract_strided_slice %17 {offsets = [88, 0], sizes = [8, 128], strides = [1, 1]} : vector<112x128xf32> to vector<8x128xf32>
    %30 = vector.extract_strided_slice %17 {offsets = [96, 0], sizes = [8, 128], strides = [1, 1]} : vector<112x128xf32> to vector<8x128xf32>
    %31 = vector.extract_strided_slice %17 {offsets = [104, 0], sizes = [8, 128], strides = [1, 1]} : vector<112x128xf32> to vector<8x128xf32>
    %32 = arith.maximumf %18, %19 : vector<8x128xf32>
    %33 = arith.maximumf %32, %20 : vector<8x128xf32>
    %34 = arith.maximumf %33, %21 : vector<8x128xf32>
    %35 = arith.maximumf %34, %22 : vector<8x128xf32>
    %36 = arith.subf %18, %35 : vector<8x128xf32>
    %37 = math.exp %36 : vector<8x128xf32>
    %38 = arith.subf %19, %35 : vector<8x128xf32>
    %39 = math.exp %38 : vector<8x128xf32>
    %40 = arith.subf %20, %35 : vector<8x128xf32>
    %41 = math.exp %40 : vector<8x128xf32>
    %42 = arith.subf %21, %35 : vector<8x128xf32>
    %43 = math.exp %42 : vector<8x128xf32>
    %44 = arith.subf %22, %35 : vector<8x128xf32>
    %45 = math.exp %44 : vector<8x128xf32>
    %46 = arith.addf %37, %39 : vector<8x128xf32>
    %47 = arith.addf %46, %41 : vector<8x128xf32>
    %48 = arith.addf %47, %43 : vector<8x128xf32>
    %49 = arith.addf %48, %45 : vector<8x128xf32>
    %cst_15 = arith.constant 1.000000e+00 : f32
    %50 = vector.broadcast %cst_15 : f32 to vector<8x128xf32>
    %51 = arith.divf %50, %49 : vector<8x128xf32>
    %52 = arith.mulf %37, %51 : vector<8x128xf32>
    %53 = arith.mulf %39, %51 : vector<8x128xf32>
    %54 = arith.mulf %41, %51 : vector<8x128xf32>
    %55 = arith.mulf %43, %51 : vector<8x128xf32>
    %cst_16 = arith.constant 9.950000e-01 : f32
    %56 = vector.broadcast %cst_16 : f32 to vector<8x128xf32>
    %57 = arith.mulf %56, %52 : vector<8x128xf32>
    %cst_17 = arith.constant 1.000000e-03 : f32
    %58 = vector.broadcast %cst_17 : f32 to vector<8x128xf32>
    %59 = arith.addf %58, %57 : vector<8x128xf32>
    %cst_18 = arith.constant 9.950000e-01 : f32
    %60 = vector.broadcast %cst_18 : f32 to vector<8x128xf32>
    %61 = arith.mulf %60, %53 : vector<8x128xf32>
    %cst_19 = arith.constant 1.000000e-03 : f32
    %62 = vector.broadcast %cst_19 : f32 to vector<8x128xf32>
    %63 = arith.addf %62, %61 : vector<8x128xf32>
    %cst_20 = arith.constant 9.950000e-01 : f32
    %64 = vector.broadcast %cst_20 : f32 to vector<8x128xf32>
    %65 = arith.mulf %64, %54 : vector<8x128xf32>
    %cst_21 = arith.constant 1.000000e-03 : f32
    %66 = vector.broadcast %cst_21 : f32 to vector<8x128xf32>
    %67 = arith.addf %66, %65 : vector<8x128xf32>
    %cst_22 = arith.constant 9.950000e-01 : f32
    %68 = vector.broadcast %cst_22 : f32 to vector<8x128xf32>
    %69 = arith.mulf %68, %55 : vector<8x128xf32>
    %cst_23 = arith.constant 1.000000e-03 : f32
    %70 = vector.broadcast %cst_23 : f32 to vector<8x128xf32>
    %71 = arith.addf %70, %69 : vector<8x128xf32>
    %72 = arith.maximumf %23, %24 : vector<8x128xf32>
    %73 = arith.maximumf %72, %25 : vector<8x128xf32>
    %74 = arith.maximumf %73, %26 : vector<8x128xf32>
    %75 = arith.maximumf %74, %27 : vector<8x128xf32>
    %76 = arith.subf %23, %75 : vector<8x128xf32>
    %77 = math.exp %76 : vector<8x128xf32>
    %78 = arith.subf %24, %75 : vector<8x128xf32>
    %79 = math.exp %78 : vector<8x128xf32>
    %80 = arith.subf %25, %75 : vector<8x128xf32>
    %81 = math.exp %80 : vector<8x128xf32>
    %82 = arith.subf %26, %75 : vector<8x128xf32>
    %83 = math.exp %82 : vector<8x128xf32>
    %84 = arith.subf %27, %75 : vector<8x128xf32>
    %85 = math.exp %84 : vector<8x128xf32>
    %86 = arith.addf %77, %79 : vector<8x128xf32>
    %87 = arith.addf %86, %81 : vector<8x128xf32>
    %88 = arith.addf %87, %83 : vector<8x128xf32>
    %89 = arith.addf %88, %85 : vector<8x128xf32>
    %cst_24 = arith.constant 1.000000e+00 : f32
    %90 = vector.broadcast %cst_24 : f32 to vector<8x128xf32>
    %91 = arith.divf %90, %89 : vector<8x128xf32>
    %92 = arith.mulf %77, %91 : vector<8x128xf32>
    %93 = arith.mulf %79, %91 : vector<8x128xf32>
    %94 = arith.mulf %81, %91 : vector<8x128xf32>
    %95 = arith.mulf %83, %91 : vector<8x128xf32>
    %cst_25 = arith.constant 9.950000e-01 : f32
    %96 = vector.broadcast %cst_25 : f32 to vector<8x128xf32>
    %97 = arith.mulf %96, %92 : vector<8x128xf32>
    %cst_26 = arith.constant 1.000000e-03 : f32
    %98 = vector.broadcast %cst_26 : f32 to vector<8x128xf32>
    %99 = arith.addf %98, %97 : vector<8x128xf32>
    %cst_27 = arith.constant 9.950000e-01 : f32
    %100 = vector.broadcast %cst_27 : f32 to vector<8x128xf32>
    %101 = arith.mulf %100, %93 : vector<8x128xf32>
    %cst_28 = arith.constant 1.000000e-03 : f32
    %102 = vector.broadcast %cst_28 : f32 to vector<8x128xf32>
    %103 = arith.addf %102, %101 : vector<8x128xf32>
    %cst_29 = arith.constant 9.950000e-01 : f32
    %104 = vector.broadcast %cst_29 : f32 to vector<8x128xf32>
    %105 = arith.mulf %104, %94 : vector<8x128xf32>
    %cst_30 = arith.constant 1.000000e-03 : f32
    %106 = vector.broadcast %cst_30 : f32 to vector<8x128xf32>
    %107 = arith.addf %106, %105 : vector<8x128xf32>
    %cst_31 = arith.constant 9.950000e-01 : f32
    %108 = vector.broadcast %cst_31 : f32 to vector<8x128xf32>
    %109 = arith.mulf %108, %95 : vector<8x128xf32>
    %cst_32 = arith.constant 1.000000e-03 : f32
    %110 = vector.broadcast %cst_32 : f32 to vector<8x128xf32>
    %111 = arith.addf %110, %109 : vector<8x128xf32>
    %cst_33 = arith.constant 1.000000e+01 : f32
    %112 = vector.broadcast %cst_33 : f32 to vector<8x128xf32>
    %113 = arith.mulf %112, %59 : vector<8x128xf32>
    %cst_34 = arith.constant -5.000000e+00 : f32
    %114 = vector.broadcast %cst_34 : f32 to vector<8x128xf32>
    %115 = arith.addf %114, %113 : vector<8x128xf32>
    %cst_35 = arith.constant 1.000000e+01 : f32
    %116 = vector.broadcast %cst_35 : f32 to vector<8x128xf32>
    %117 = arith.mulf %116, %99 : vector<8x128xf32>
    %cst_36 = arith.constant -5.000000e+00 : f32
    %118 = vector.broadcast %cst_36 : f32 to vector<8x128xf32>
    %119 = arith.addf %118, %117 : vector<8x128xf32>
    %120 = arith.addf %59, %63 : vector<8x128xf32>
    %121 = arith.addf %99, %103 : vector<8x128xf32>
    %cst_37 = arith.constant 1.000000e+01 : f32
    %122 = vector.broadcast %cst_37 : f32 to vector<8x128xf32>
    %123 = arith.mulf %122, %120 : vector<8x128xf32>
    %cst_38 = arith.constant -5.000000e+00 : f32
    %124 = vector.broadcast %cst_38 : f32 to vector<8x128xf32>
    %125 = arith.addf %124, %123 : vector<8x128xf32>
    %cst_39 = arith.constant 1.000000e+01 : f32
    %126 = vector.broadcast %cst_39 : f32 to vector<8x128xf32>
    %127 = arith.mulf %126, %121 : vector<8x128xf32>
    %cst_40 = arith.constant -5.000000e+00 : f32
    %128 = vector.broadcast %cst_40 : f32 to vector<8x128xf32>
    %129 = arith.addf %128, %127 : vector<8x128xf32>
    %130 = arith.addf %120, %67 : vector<8x128xf32>
    %131 = arith.addf %121, %107 : vector<8x128xf32>
    %cst_41 = arith.constant 1.000000e+01 : f32
    %132 = vector.broadcast %cst_41 : f32 to vector<8x128xf32>
    %133 = arith.mulf %132, %130 : vector<8x128xf32>
    %cst_42 = arith.constant -5.000000e+00 : f32
    %134 = vector.broadcast %cst_42 : f32 to vector<8x128xf32>
    %135 = arith.addf %134, %133 : vector<8x128xf32>
    %cst_43 = arith.constant 1.000000e+01 : f32
    %136 = vector.broadcast %cst_43 : f32 to vector<8x128xf32>
    %137 = arith.mulf %136, %131 : vector<8x128xf32>
    %cst_44 = arith.constant -5.000000e+00 : f32
    %138 = vector.broadcast %cst_44 : f32 to vector<8x128xf32>
    %139 = arith.addf %138, %137 : vector<8x128xf32>
    %140 = arith.addf %130, %71 : vector<8x128xf32>
    %141 = arith.addf %131, %111 : vector<8x128xf32>
    %cst_45 = arith.constant 1.000000e+01 : f32
    %142 = vector.broadcast %cst_45 : f32 to vector<8x128xf32>
    %143 = arith.mulf %142, %140 : vector<8x128xf32>
    %cst_46 = arith.constant -5.000000e+00 : f32
    %144 = vector.broadcast %cst_46 : f32 to vector<8x128xf32>
    %145 = arith.addf %144, %143 : vector<8x128xf32>
    %cst_47 = arith.constant 1.000000e+01 : f32
    %146 = vector.broadcast %cst_47 : f32 to vector<8x128xf32>
    %147 = arith.mulf %146, %141 : vector<8x128xf32>
    %cst_48 = arith.constant -5.000000e+00 : f32
    %148 = vector.broadcast %cst_48 : f32 to vector<8x128xf32>
    %149 = arith.addf %148, %147 : vector<8x128xf32>
    %cst_49 = arith.constant 5.000000e+00 : f32
    %150 = vector.broadcast %cst_49 : f32 to vector<8x128xf32>
    %cst_50 = arith.constant 5.000000e+00 : f32
    %151 = vector.broadcast %cst_50 : f32 to vector<8x128xf32>
    %cst_51 = arith.constant 0.000000e+00 : f32
    %152 = vector.broadcast %cst_51 : f32 to vector<8x128xf32>
    %153 = arith.maximumf %28, %152 : vector<8x128xf32>
    %154 = math.absf %28 : vector<8x128xf32>
    %cst_52 = arith.constant 0.000000e+00 : f32
    %155 = vector.broadcast %cst_52 : f32 to vector<8x128xf32>
    %156 = arith.subf %155, %154 : vector<8x128xf32>
    %157 = math.exp %156 : vector<8x128xf32>
    %cst_53 = arith.constant 1.000000e+00 : f32
    %158 = vector.broadcast %cst_53 : f32 to vector<8x128xf32>
    %159 = arith.addf %158, %157 : vector<8x128xf32>
    %160 = math.log %159 : vector<8x128xf32>
    %161 = arith.addf %153, %160 : vector<8x128xf32>
    %cst_54 = arith.constant 1.000000e-03 : f32
    %162 = vector.broadcast %cst_54 : f32 to vector<8x128xf32>
    %163 = arith.addf %162, %161 : vector<8x128xf32>
    %cst_55 = arith.constant 0.000000e+00 : f32
    %164 = vector.broadcast %cst_55 : f32 to vector<8x128xf32>
    %165 = arith.maximumf %29, %164 : vector<8x128xf32>
    %166 = math.absf %29 : vector<8x128xf32>
    %cst_56 = arith.constant 0.000000e+00 : f32
    %167 = vector.broadcast %cst_56 : f32 to vector<8x128xf32>
    %168 = arith.subf %167, %166 : vector<8x128xf32>
    %169 = math.exp %168 : vector<8x128xf32>
    %cst_57 = arith.constant 1.000000e+00 : f32
    %170 = vector.broadcast %cst_57 : f32 to vector<8x128xf32>
    %171 = arith.addf %170, %169 : vector<8x128xf32>
    %172 = math.log %171 : vector<8x128xf32>
    %173 = arith.addf %165, %172 : vector<8x128xf32>
    %cst_58 = arith.constant 1.000000e-03 : f32
    %174 = vector.broadcast %cst_58 : f32 to vector<8x128xf32>
    %175 = arith.addf %174, %173 : vector<8x128xf32>
    %cst_59 = arith.constant 0.000000e+00 : f32
    %176 = vector.broadcast %cst_59 : f32 to vector<8x128xf32>
    %177 = arith.maximumf %30, %176 : vector<8x128xf32>
    %178 = math.absf %30 : vector<8x128xf32>
    %cst_60 = arith.constant 0.000000e+00 : f32
    %179 = vector.broadcast %cst_60 : f32 to vector<8x128xf32>
    %180 = arith.subf %179, %178 : vector<8x128xf32>
    %181 = math.exp %180 : vector<8x128xf32>
    %cst_61 = arith.constant 1.000000e+00 : f32
    %182 = vector.broadcast %cst_61 : f32 to vector<8x128xf32>
    %183 = arith.addf %182, %181 : vector<8x128xf32>
    %184 = math.log %183 : vector<8x128xf32>
    %185 = arith.addf %177, %184 : vector<8x128xf32>
    %cst_62 = arith.constant 1.000000e-03 : f32
    %186 = vector.broadcast %cst_62 : f32 to vector<8x128xf32>
    %187 = arith.addf %186, %185 : vector<8x128xf32>
    %cst_63 = arith.constant 0.000000e+00 : f32
    %188 = vector.broadcast %cst_63 : f32 to vector<8x128xf32>
    %189 = arith.maximumf %31, %188 : vector<8x128xf32>
    %190 = math.absf %31 : vector<8x128xf32>
    %cst_64 = arith.constant 0.000000e+00 : f32
    %191 = vector.broadcast %cst_64 : f32 to vector<8x128xf32>
    %192 = arith.subf %191, %190 : vector<8x128xf32>
    %193 = math.exp %192 : vector<8x128xf32>
    %cst_65 = arith.constant 1.000000e+00 : f32
    %194 = vector.broadcast %cst_65 : f32 to vector<8x128xf32>
    %195 = arith.addf %194, %193 : vector<8x128xf32>
    %196 = math.log %195 : vector<8x128xf32>
    %197 = arith.addf %189, %196 : vector<8x128xf32>
    %cst_66 = arith.constant 1.000000e-03 : f32
    %198 = vector.broadcast %cst_66 : f32 to vector<8x128xf32>
    %199 = arith.addf %198, %197 : vector<8x128xf32>
    %cst_67 = arith.constant -5.000000e+00 : f32
    %200 = vector.broadcast %cst_67 : f32 to vector<8x128xf32>
    %201 = arith.cmpf oge, %0, %200 : vector<8x128xf32>
    %cst_68 = arith.constant 5.000000e+00 : f32
    %202 = vector.broadcast %cst_68 : f32 to vector<8x128xf32>
    %203 = arith.cmpf ole, %0, %202 : vector<8x128xf32>
    %204 = arith.andi %201, %203 : vector<8x128xi1>
    %cst_69 = arith.constant -5.000000e+00 : f32
    %cst_70 = arith.constant 5.000000e+00 : f32
    %205 = vector.broadcast %cst_69 : f32 to vector<8x128xf32>
    %206 = arith.maximumf %205, %0 : vector<8x128xf32>
    %207 = vector.broadcast %cst_70 : f32 to vector<8x128xf32>
    %208 = arith.minimumf %207, %206 : vector<8x128xf32>
    %c0_i32 = arith.constant 0 : i32
    %209 = vector.broadcast %c0_i32 : i32 to vector<8x128xi32>
    %210 = arith.cmpf oge, %208, %115 : vector<8x128xf32>
    %211 = arith.extui %210 : vector<8x128xi1> to vector<8x128xi32>
    %212 = arith.addi %209, %211 : vector<8x128xi32>
    %213 = arith.cmpf oge, %208, %125 : vector<8x128xf32>
    %214 = arith.extui %213 : vector<8x128xi1> to vector<8x128xi32>
    %215 = arith.addi %212, %214 : vector<8x128xi32>
    %216 = arith.cmpf oge, %208, %135 : vector<8x128xf32>
    %217 = arith.extui %216 : vector<8x128xi1> to vector<8x128xi32>
    %218 = arith.addi %215, %217 : vector<8x128xi32>
    %219 = arith.cmpf oge, %208, %145 : vector<8x128xf32>
    %220 = arith.extui %219 : vector<8x128xi1> to vector<8x128xi32>
    %221 = arith.addi %218, %220 : vector<8x128xi32>
    %cst_71 = arith.constant 5.00000095 : f32
    %222 = vector.broadcast %cst_71 : f32 to vector<8x128xf32>
    %223 = arith.cmpf oge, %208, %222 : vector<8x128xf32>
    %224 = arith.extui %223 : vector<8x128xi1> to vector<8x128xi32>
    %225 = arith.addi %221, %224 : vector<8x128xi32>
    %c0_i32_72 = arith.constant 0 : i32
    %c4_i32 = arith.constant 4 : i32
    %226 = vector.broadcast %c0_i32_72 : i32 to vector<8x128xi32>
    %227 = arith.maxsi %226, %225 : vector<8x128xi32>
    %228 = vector.broadcast %c4_i32 : i32 to vector<8x128xi32>
    %229 = arith.minsi %228, %227 : vector<8x128xi32>
    %c1_i32 = arith.constant 1 : i32
    %230 = vector.broadcast %c1_i32 : i32 to vector<8x128xi32>
    %231 = arith.cmpi eq, %229, %230 : vector<8x128xi32>
    %232 = arith.select %231, %125, %115 : vector<8x128xi1>, vector<8x128xf32>
    %233 = arith.select %231, %129, %119 : vector<8x128xi1>, vector<8x128xf32>
    %c2_i32 = arith.constant 2 : i32
    %234 = vector.broadcast %c2_i32 : i32 to vector<8x128xi32>
    %235 = arith.cmpi eq, %229, %234 : vector<8x128xi32>
    %236 = arith.select %235, %135, %232 : vector<8x128xi1>, vector<8x128xf32>
    %237 = arith.select %235, %139, %233 : vector<8x128xi1>, vector<8x128xf32>
    %c3_i32 = arith.constant 3 : i32
    %238 = vector.broadcast %c3_i32 : i32 to vector<8x128xi32>
    %239 = arith.cmpi eq, %229, %238 : vector<8x128xi32>
    %240 = arith.select %239, %145, %236 : vector<8x128xi1>, vector<8x128xf32>
    %241 = arith.select %239, %149, %237 : vector<8x128xi1>, vector<8x128xf32>
    %c4_i32_73 = arith.constant 4 : i32
    %242 = vector.broadcast %c4_i32_73 : i32 to vector<8x128xi32>
    %243 = arith.cmpi eq, %229, %242 : vector<8x128xi32>
    %244 = arith.select %243, %150, %240 : vector<8x128xi1>, vector<8x128xf32>
    %245 = arith.select %243, %151, %241 : vector<8x128xi1>, vector<8x128xf32>
    %cst_74 = arith.constant -5.000000e+00 : f32
    %246 = vector.broadcast %cst_74 : f32 to vector<8x128xf32>
    %cst_75 = arith.constant -5.000000e+00 : f32
    %247 = vector.broadcast %cst_75 : f32 to vector<8x128xf32>
    %cst_76 = arith.constant 1.000000e+00 : f32
    %248 = vector.broadcast %cst_76 : f32 to vector<8x128xf32>
    %cst_77 = arith.constant 1.000000e+00 : f32
    %249 = vector.broadcast %cst_77 : f32 to vector<8x128xf32>
    %c1_i32_78 = arith.constant 1 : i32
    %250 = vector.broadcast %c1_i32_78 : i32 to vector<8x128xi32>
    %251 = arith.cmpi eq, %229, %250 : vector<8x128xi32>
    %252 = arith.select %251, %115, %246 : vector<8x128xi1>, vector<8x128xf32>
    %253 = arith.select %251, %119, %247 : vector<8x128xi1>, vector<8x128xf32>
    %254 = arith.select %251, %163, %248 : vector<8x128xi1>, vector<8x128xf32>
    %c0_i32_79 = arith.constant 0 : i32
    %255 = vector.broadcast %c0_i32_79 : i32 to vector<8x128xi32>
    %256 = arith.cmpi eq, %229, %255 : vector<8x128xi32>
    %257 = arith.select %256, %163, %249 : vector<8x128xi1>, vector<8x128xf32>
    %c2_i32_80 = arith.constant 2 : i32
    %258 = vector.broadcast %c2_i32_80 : i32 to vector<8x128xi32>
    %259 = arith.cmpi eq, %229, %258 : vector<8x128xi32>
    %260 = arith.select %259, %125, %252 : vector<8x128xi1>, vector<8x128xf32>
    %261 = arith.select %259, %129, %253 : vector<8x128xi1>, vector<8x128xf32>
    %262 = arith.select %259, %175, %254 : vector<8x128xi1>, vector<8x128xf32>
    %c1_i32_81 = arith.constant 1 : i32
    %263 = vector.broadcast %c1_i32_81 : i32 to vector<8x128xi32>
    %264 = arith.cmpi eq, %229, %263 : vector<8x128xi32>
    %265 = arith.select %264, %175, %257 : vector<8x128xi1>, vector<8x128xf32>
    %c3_i32_82 = arith.constant 3 : i32
    %266 = vector.broadcast %c3_i32_82 : i32 to vector<8x128xi32>
    %267 = arith.cmpi eq, %229, %266 : vector<8x128xi32>
    %268 = arith.select %267, %135, %260 : vector<8x128xi1>, vector<8x128xf32>
    %269 = arith.select %267, %139, %261 : vector<8x128xi1>, vector<8x128xf32>
    %270 = arith.select %267, %187, %262 : vector<8x128xi1>, vector<8x128xf32>
    %c2_i32_83 = arith.constant 2 : i32
    %271 = vector.broadcast %c2_i32_83 : i32 to vector<8x128xi32>
    %272 = arith.cmpi eq, %229, %271 : vector<8x128xi32>
    %273 = arith.select %272, %187, %265 : vector<8x128xi1>, vector<8x128xf32>
    %c4_i32_84 = arith.constant 4 : i32
    %274 = vector.broadcast %c4_i32_84 : i32 to vector<8x128xi32>
    %275 = arith.cmpi eq, %229, %274 : vector<8x128xi32>
    %276 = arith.select %275, %145, %268 : vector<8x128xi1>, vector<8x128xf32>
    %277 = arith.select %275, %149, %269 : vector<8x128xi1>, vector<8x128xf32>
    %278 = arith.select %275, %199, %270 : vector<8x128xi1>, vector<8x128xf32>
    %c3_i32_85 = arith.constant 3 : i32
    %279 = vector.broadcast %c3_i32_85 : i32 to vector<8x128xi32>
    %280 = arith.cmpi eq, %229, %279 : vector<8x128xi32>
    %281 = arith.select %280, %199, %273 : vector<8x128xi1>, vector<8x128xf32>
    %282 = arith.subf %244, %276 : vector<8x128xf32>
    %283 = arith.subf %245, %277 : vector<8x128xf32>
    %cst_86 = arith.constant 1.000000e+00 : f32
    %284 = vector.broadcast %cst_86 : f32 to vector<8x128xf32>
    %285 = arith.divf %284, %282 : vector<8x128xf32>
    %286 = arith.mulf %283, %285 : vector<8x128xf32>
    %287 = arith.subf %208, %276 : vector<8x128xf32>
    %288 = arith.mulf %287, %285 : vector<8x128xf32>
    %cst_87 = arith.constant 1.000000e+00 : f32
    %289 = vector.broadcast %cst_87 : f32 to vector<8x128xf32>
    %290 = arith.subf %289, %288 : vector<8x128xf32>
    %291 = arith.mulf %288, %290 : vector<8x128xf32>
    %292 = arith.mulf %286, %288 : vector<8x128xf32>
    %293 = arith.mulf %292, %288 : vector<8x128xf32>
    %294 = arith.mulf %278, %291 : vector<8x128xf32>
    %295 = arith.addf %293, %294 : vector<8x128xf32>
    %296 = arith.mulf %283, %295 : vector<8x128xf32>
    %297 = arith.addf %278, %281 : vector<8x128xf32>
    %cst_88 = arith.constant 2.000000e+00 : f32
    %298 = vector.broadcast %cst_88 : f32 to vector<8x128xf32>
    %299 = arith.mulf %298, %286 : vector<8x128xf32>
    %300 = arith.subf %297, %299 : vector<8x128xf32>
    %301 = arith.mulf %300, %291 : vector<8x128xf32>
    %302 = arith.addf %286, %301 : vector<8x128xf32>
    %cst_89 = arith.constant 1.000000e+00 : f32
    %303 = vector.broadcast %cst_89 : f32 to vector<8x128xf32>
    %304 = arith.divf %303, %302 : vector<8x128xf32>
    %305 = arith.mulf %296, %304 : vector<8x128xf32>
    %306 = arith.addf %277, %305 : vector<8x128xf32>
    %307 = arith.mulf %286, %286 : vector<8x128xf32>
    %308 = arith.mulf %281, %288 : vector<8x128xf32>
    %309 = arith.mulf %308, %288 : vector<8x128xf32>
    %cst_90 = arith.constant 2.000000e+00 : f32
    %310 = vector.broadcast %cst_90 : f32 to vector<8x128xf32>
    %311 = arith.mulf %310, %286 : vector<8x128xf32>
    %312 = arith.mulf %311, %291 : vector<8x128xf32>
    %313 = arith.addf %309, %312 : vector<8x128xf32>
    %cst_91 = arith.constant 1.000000e+00 : f32
    %314 = vector.broadcast %cst_91 : f32 to vector<8x128xf32>
    %315 = arith.subf %314, %288 : vector<8x128xf32>
    %316 = arith.mulf %278, %315 : vector<8x128xf32>
    %cst_92 = arith.constant 1.000000e+00 : f32
    %317 = vector.broadcast %cst_92 : f32 to vector<8x128xf32>
    %318 = arith.subf %317, %288 : vector<8x128xf32>
    %319 = arith.mulf %316, %318 : vector<8x128xf32>
    %320 = arith.addf %313, %319 : vector<8x128xf32>
    %321 = arith.mulf %307, %320 : vector<8x128xf32>
    %322 = arith.mulf %321, %304 : vector<8x128xf32>
    %323 = arith.mulf %322, %304 : vector<8x128xf32>
    %324 = math.log %323 : vector<8x128xf32>
    %325 = arith.select %204, %306, %0 : vector<8x128xi1>, vector<8x128xf32>
    %c0_93 = arith.constant 0 : index
    %c0_94 = arith.constant 0 : index
    %326 = vector.load %arg8[%c0_93, %c0_94] : memref<8x128xf32, #tpu.memory_space<vmem>>, vector<8x128xf32>
    tpu.vector_store %arg8[%c0_93, %c0_94], %325 {strides = array<i32>} : memref<8x128xf32, #tpu.memory_space<vmem>>, vector<8x128xf32>,
    %cst_95 = arith.constant 0.000000e+00 : f32
    %327 = vector.broadcast %cst_95 : f32 to vector<8x128xf32>
    %328 = arith.select %204, %324, %327 : vector<8x128xi1>, vector<8x128xf32>
    %c0_96 = arith.constant 0 : index
    %c0_97 = arith.constant 0 : index
    %329 = vector.load %arg9[%c0_96, %c0_97] : memref<8x128xf32, #tpu.memory_space<vmem>>, vector<8x128xf32>
    tpu.vector_store %arg9[%c0_96, %c0_97], %328 {strides = array<i32>} : memref<8x128xf32, #tpu.memory_space<vmem>>, vector<8x128xf32>,
    return
  }
  func.func @transform_0(%arg0: i32) -> (i32, i32) {
    %c0_i32 = arith.constant 0 : i32
    %c0_i32_0 = arith.constant 0 : i32
    return %c0_i32, %arg0 : i32, i32
  }
  func.func @transform_1(%arg0: i32) -> (i32, i32) {
    %c0_i32 = arith.constant 0 : i32
    %c0_i32_0 = arith.constant 0 : i32
    %c0_i32_1 = arith.constant 0 : i32
    return %c0_i32, %c0_i32_0 : i32, i32
  }
  func.func @transform_2(%arg0: i32) -> (i32, i32) {
    %c0_i32 = arith.constant 0 : i32
    %c0_i32_0 = arith.constant 0 : i32
    %c0_i32_1 = arith.constant 0 : i32
    return %c0_i32, %c0_i32_0 : i32, i32
  }
  func.func @transform_3(%arg0: i32) -> (i32, i32) {
    %c0_i32 = arith.constant 0 : i32
    %c0_i32_0 = arith.constant 0 : i32
    %c0_i32_1 = arith.constant 0 : i32
    return %c0_i32, %c0_i32_0 : i32, i32
  }
  func.func @transform_4(%arg0: i32) -> (i32, i32) {
    %c0_i32 = arith.constant 0 : i32
    %c0_i32_0 = arith.constant 0 : i32
    %c0_i32_1 = arith.constant 0 : i32
    return %c0_i32, %c0_i32_0 : i32, i32
  }
  func.func @transform_5(%arg0: i32) -> (i32, i32) {
    %c0_i32 = arith.constant 0 : i32
    %c0_i32_0 = arith.constant 0 : i32
    %c0_i32_1 = arith.constant 0 : i32
    return %c0_i32, %c0_i32_0 : i32, i32
  }
  func.func @transform_6(%arg0: i32) -> (i32, i32) {
    %c0_i32 = arith.constant 0 : i32
    %c0_i32_0 = arith.constant 0 : i32
    %c0_i32_1 = arith.constant 0 : i32
    return %c0_i32, %c0_i32_0 : i32, i32
  }
  func.func @transform_7(%arg0: i32) -> (i32, i32) {
    %c0_i32 = arith.constant 0 : i32
    %c0_i32_0 = arith.constant 0 : i32
    return %c0_i32, %arg0 : i32, i32
  }
  func.func @transform_8(%arg0: i32) -> (i32, i32) {
    %c0_i32 = arith.constant 0 : i32
    %c0_i32_0 = arith.constant 0 : i32
    return %c0_i32, %arg0 : i32, i32
  }
}

</mosaic_0001>

<bundles_post_ra>
// kernel: tpu_custom_call.1
= control target key start
LH: loop header
LB: loop body
LE: loop exit
PB: predicated region body
PF: predicated region fallthrough
CT: control target
= control target key end

     0   :  { %14 = vsyncpa [#allocation3], 0  ;;  %s1849_s0 = inlined_call_operand.hbm [shape: f32[8,128], index: 0, kind: input, shape index: {}]   ;;  %s1850_s1 = inlined_call_operand.hbm [shape: f32[64,8], index: 1, kind: input, shape index: {}]   ;;  %s1851_s2 = inlined_call_operand.hbm [shape: f32[64,1], index: 2, kind: input, shape index: {}]   ;;  %s1852_s3 = inlined_call_operand.hbm [shape: f32[64,64], index: 3, kind: input, shape index: {}]   ;;  %s1853_s4 = inlined_call_operand.hbm [shape: f32[64,1], index: 4, kind: input, shape index: {}]   ;;  %s1854_s5 = inlined_call_operand.hbm [shape: f32[112,64], index: 5, kind: input, shape index: {}]   ;;  %s1855_s6 = inlined_call_operand.hbm [shape: f32[112,1], index: 6, kind: input, shape index: {}]   ;;  %s1856_s7 = inlined_call_operand.hbm [shape: f32[8,128], index: 7, kind: output, shape index: {0}]   ;;  %s1857_s8 = inlined_call_operand.hbm [shape: f32[8,128], index: 8, kind: output, shape index: {1}]  }
   0x1   :  { %15 = vsyncpa [#allocation6], 0 }
   0x2   :  { %16 = vsyncpa [#allocation9], 0 }
   0x3   :  { %17 = vsyncpa [#allocation12], 0 }
   0x4   :  { %18 = vsyncpa [#allocation4], 0 }
   0x5   :  { %19 = vsyncpa [#allocation16], 0  ;;  %s1547_s27 = smov [#allocation5]   ;;  %s1337_s9 = scalar_lea.hbm %s1850_s1, 1024 }
   0x6   :  { %s35_s28 = sshll.u32 %s1547_s27, 4  ;;  %p1338_p0 = scmp.ne.s32.totalorder %s1850_s1, %s1337_s9  ;;  %s36_s28 = int_to_ptr.vmem [resolvable:$true] %s35_s28 }
   0x7   :  { %p1341_p1 = scmp.lt.u32.totalorder %s1337_s9, %s1850_s1 }
   0x9   :  { %p1343_p2 = pnand %p1341_p1, %p1338_p0 }
   0xb   :  { %1346 = shalt.err (!%p1343_p2)
}
   0xc   :  { %s1347_s14 = scalar_lea.vmem %s36_s28, 1024  ;;  %p1352_p4 = scmp.lt.s32.totalorder %s36_s28, %s36_s28 }
   0xd   :  { %p1348_p3 = scmp.ne.s32.totalorder %s36_s28, %s1347_s14  ;;  %p1353_p5 = scmp.lt.s32.totalorder %s1347_s14, %s1347_s14 }
   0xf   :  { %p1354_p6 = por %p1353_p5, %p1352_p4 }
  0x11   :  { %p1355_p7 = pnand %p1354_p6, %p1348_p3 }
  0x13   :  { %1358 = shalt.err (!%p1355_p7)
}
  0x14   :  { %s1548_s15 = smov 128   ;;  %s1549_s16 = smov 8  }
  0x15   :  { %41 = dma.hbm_to_vmem [thread:$0]  %s1850_s1, 1024, %s36_s28, [#allocation6], %s1548_s15, %s1548_s15, %s1549_s16  }
  0x16   :  { %s1550_s19 = smov [#allocation8]   ;;  %s1551_s21 = smov [#allocation11]  }
  0x17   :  { %s59_s20 = sshll.u32 %s1550_s19, 4  ;;  %s83_s22 = sshll.u32 %s1551_s21, 4  ;;  %s60_s20 = int_to_ptr.vmem [resolvable:$true] %s59_s20  ;;  %s84_s22 = int_to_ptr.vmem [resolvable:$true] %s83_s22 }
  0x18   :  { %s1359_s25 = scalar_lea.hbm %s1852_s3, 1024 }
  0x19   :  { %p1360_p8 = scmp.ne.s32.totalorder %s1852_s3, %s1359_s25  ;;  %p1363_p9 = scmp.lt.u32.totalorder %s1359_s25, %s1852_s3 }
  0x1b   :  { %p1365_p10 = pnand %p1363_p9, %p1360_p8 }
  0x1d   :  { %1368 = shalt.err (!%p1365_p10)
}
  0x1e   :  { %s1369_s1 = scalar_lea.vmem %s60_s20, 1024  ;;  %p1374_p12 = scmp.lt.s32.totalorder %s60_s20, %s60_s20 }
  0x1f   :  { %p1370_p11 = scmp.ne.s32.totalorder %s60_s20, %s1369_s1  ;;  %p1375_p13 = scmp.lt.s32.totalorder %s1369_s1, %s1369_s1 }
  0x21   :  { %p1376_p0 = por %p1375_p13, %p1374_p12 }
  0x23   :  { %p1377_p1 = pnand %p1376_p0, %p1370_p11 }
  0x25   :  { %1380 = shalt.err (!%p1377_p1)
}
  0x26   :  { %65 = dma.hbm_to_vmem [thread:$0]  %s1852_s3, 1024, %s60_s20, [#allocation9], %s1548_s15, %s1548_s15, %s1549_s16  }
  0x27   :  { %s1381_s12 = scalar_lea.hbm %s1854_s5, 1792 }
  0x28   :  { %p1382_p2 = scmp.ne.s32.totalorder %s1854_s5, %s1381_s12  ;;  %p1385_p3 = scmp.lt.u32.totalorder %s1381_s12, %s1854_s5 }
  0x2a   :  { %p1387_p4 = pnand %p1385_p3, %p1382_p2 }
  0x2c   :  { %1390 = shalt.err (!%p1387_p4)
}
  0x2d   :  { %s1391_s19 = scalar_lea.vmem %s84_s22, 1792  ;;  %p1396_p6 = scmp.lt.s32.totalorder %s84_s22, %s84_s22 }
  0x2e   :  { %p1392_p5 = scmp.ne.s32.totalorder %s84_s22, %s1391_s19  ;;  %p1397_p7 = scmp.lt.s32.totalorder %s1391_s19, %s1391_s19 }
  0x30   :  { %p1398_p8 = por %p1397_p7, %p1396_p6 }
  0x32   :  { %p1399_p9 = pnand %p1398_p8, %p1392_p5 }
  0x34   :  { %1402 = shalt.err (!%p1399_p9)
}
  0x35   :  { %89 = dma.hbm_to_vmem [thread:$0]  %s1854_s5, 1792, %s84_s22, [#allocation12], %s1548_s15, %s1548_s15, %s1549_s16  }
  0x36   :  { %s1552_s21 = smov [#allocation2]   ;;  %s1553_s24 = smov [#allocation7]  }
  0x37   :  { %s26_s23 = sshll.u32 %s1552_s21, 4  ;;  %s47_s25 = sshll.u32 %s1553_s24, 4  ;;  %s27_s23 = int_to_ptr.vmem [resolvable:$true] %s26_s23  ;;  %s48_s25 = int_to_ptr.vmem [resolvable:$true] %s47_s25 }
  0x38   :  { %s1403_s29 = scalar_lea.hbm %s1849_s0, 128 }
  0x39   :  { %p1404_p10 = scmp.ne.s32.totalorder %s1849_s0, %s1403_s29  ;;  %p1407_p11 = scmp.lt.u32.totalorder %s1403_s29, %s1849_s0 }
  0x3b   :  { %p1409_p12 = pnand %p1407_p11, %p1404_p10 }
  0x3d   :  { %1412 = shalt.err (!%p1409_p12)
}
  0x3e   :  { %s1413_s5 = scalar_lea.vmem %s27_s23, 128  ;;  %p1418_p0 = scmp.lt.s32.totalorder %s27_s23, %s27_s23 }
  0x3f   :  { %p1414_p13 = scmp.ne.s32.totalorder %s27_s23, %s1413_s5  ;;  %p1419_p1 = scmp.lt.s32.totalorder %s1413_s5, %s1413_s5 }
  0x41   :  { %p1420_p2 = por %p1419_p1, %p1418_p0 }
  0x43   :  { %p1421_p3 = pnand %p1420_p2, %p1414_p13 }
  0x45   :  { %1424 = shalt.err (!%p1421_p3)
}
  0x46   :  { %29 = dma.hbm_to_vmem [thread:$0]  %s1849_s0, 128, %s27_s23, [#allocation3]  }
  0x47   :  { %s1425_s13 = scalar_lea.hbm %s1851_s2, 1024 }
  0x48   :  { %p1426_p4 = scmp.ne.s32.totalorder %s1851_s2, %s1425_s13  ;;  %p1429_p5 = scmp.lt.u32.totalorder %s1425_s13, %s1851_s2 }
  0x4a   :  { %p1431_p6 = pnand %p1429_p5, %p1426_p4 }
  0x4c   :  { %1434 = shalt.err (!%p1431_p6)
}
  0x4d   :  { %s1435_s3 = scalar_lea.vmem %s48_s25, 1024  ;;  %p1440_p8 = scmp.lt.s32.totalorder %s48_s25, %s48_s25 }
  0x4e   :  { %p1436_p7 = scmp.ne.s32.totalorder %s48_s25, %s1435_s3  ;;  %p1441_p9 = scmp.lt.s32.totalorder %s1435_s3, %s1435_s3 }
  0x50   :  { %p1442_p10 = por %p1441_p9, %p1440_p8 }
  0x52   :  { %p1443_p11 = pnand %p1442_p10, %p1436_p7 }
  0x54   :  { %1446 = shalt.err (!%p1443_p11)
}
  0x55   :  { %53 = dma.hbm_to_vmem [thread:$0]  %s1851_s2, 1024, %s48_s25, [#allocation6], %s1548_s15, %s1548_s15, %s1549_s16  }
  0x56   :  { %s1554_s21 = smov [#allocation10]   ;;  %s1555_s24 = smov [#allocation13]  }
  0x57   :  { %s71_s23 = sshll.u32 %s1554_s21, 4  ;;  %s95_s26 = sshll.u32 %s1555_s24, 4  ;;  %s72_s23 = int_to_ptr.vmem [resolvable:$true] %s71_s23  ;;  %s96_s26 = int_to_ptr.vmem [resolvable:$true] %s95_s26 }
  0x58   :  { %s1447_s30 = scalar_lea.hbm %s1853_s4, 1024 }
  0x59   :  { %p1448_p12 = scmp.ne.s32.totalorder %s1853_s4, %s1447_s30  ;;  %p1451_p13 = scmp.lt.u32.totalorder %s1447_s30, %s1853_s4 }
  0x5b   :  { %p1453_p0 = pnand %p1451_p13, %p1448_p12 }
  0x5d   :  { %1456 = shalt.err (!%p1453_p0)
}
  0x5e   :  { %s1457_s2 = scalar_lea.vmem %s72_s23, 1024  ;;  %p1462_p2 = scmp.lt.s32.totalorder %s72_s23, %s72_s23 }
  0x5f   :  { %p1458_p1 = scmp.ne.s32.totalorder %s72_s23, %s1457_s2  ;;  %p1463_p3 = scmp.lt.s32.totalorder %s1457_s2, %s1457_s2 }
  0x61   :  { %p1464_p4 = por %p1463_p3, %p1462_p2 }
  0x63   :  { %p1465_p5 = pnand %p1464_p4, %p1458_p1 }
  0x65   :  { %1468 = shalt.err (!%p1465_p5)
}
  0x66   :  { %77 = dma.hbm_to_vmem [thread:$0]  %s1853_s4, 1024, %s72_s23, [#allocation9], %s1548_s15, %s1548_s15, %s1549_s16  }
  0x67   :  { %s1469_s12 = scalar_lea.hbm %s1855_s6, 1792 }
  0x68   :  { %p1470_p6 = scmp.ne.s32.totalorder %s1855_s6, %s1469_s12  ;;  %p1473_p7 = scmp.lt.u32.totalorder %s1469_s12, %s1855_s6 }
  0x6a   :  { %p1475_p8 = pnand %p1473_p7, %p1470_p6 }
  0x6c   :  { %1478 = shalt.err (!%p1475_p8)
}
  0x6d   :  { %s1479_s19 = scalar_lea.vmem %s96_s26, 1792  ;;  %p1484_p10 = scmp.lt.s32.totalorder %s96_s26, %s96_s26 }
  0x6e   :  { %p1480_p9 = scmp.ne.s32.totalorder %s96_s26, %s1479_s19  ;;  %p1485_p11 = scmp.lt.s32.totalorder %s1479_s19, %s1479_s19 }
  0x70   :  { %p1486_p12 = por %p1485_p11, %p1484_p10 }
  0x72   :  { %p1487_p13 = pnand %p1486_p12, %p1480_p9 }
  0x74   :  { %1490 = shalt.err (!%p1487_p13)
}
  0x75   :  { %101 = dma.hbm_to_vmem [thread:$0]  %s1855_s6, 1792, %s96_s26, [#allocation12], %s1548_s15, %s1548_s15, %s1549_s16  }
  0x76   :  { %1535 = dma.done.wait [#allocation3], 128  }
  0x77   :  { %1536 = vsyncadd [#allocation3], 4294967168 }
  0x78   :  { %1537 = dma.done.wait [#allocation6], 2048  }
  0x79   :  { %1538 = vsyncadd [#allocation6], 4294965248 }
  0x7a   :  { %1539 = dma.done.wait [#allocation9], 2048  }
  0x7b   :  { %1540 = vsyncadd [#allocation9], 4294965248 }
  0x7c   :  { %1541 = dma.done.wait [#allocation12], 3584  }
  0x7d   :  { %1542 = vsyncadd [#allocation12], 4294963712  ;;  %v1556_v0 = vmov 0   ;;  %vm180_vm0 = vcmask 64512   ;;  %v1708_v1 = vld [vmem:[#allocation2] sm:$0xff]  ;;  %v124_v2 = vld [vmem:[#allocation5] sm:$0xff] }
  0x7e   :  { %1256 = vset.pattern.permute.xlu0 %v1556_v0  ;;  %1257 = vset.pattern.permute.xlu1 %v1556_v0  ;;  %v125_v3 = vld [vmem:[#allocation5 + $0x8] sm:$0xff]  ;;  %v126_v4 = vld [vmem:[#allocation5 + $0x10] sm:$0xff]  ;;  %v132_v5 = vld [vmem:[#allocation7] sm:$0xff]  ;;  %vm374_vm1 = vcmask 523264   ;;  %vm923_vm14 = vcmp.ge.f32.partialorder %v1708_v1, -5.0  ;;  %vm924_vm15 = vcmp.le.f32.partialorder %v1708_v1, 5.0 }
  0x7f   :  { %1125 = vmatprep.subr.mxu1 %v1708_v1  ;;  %1127 = vmatprep.mubr.msk.f32.mxu1 %vm180_vm0, %v124_v2  ;;  %v134_v6 = vld [vmem:[#allocation7 + $0x10] sm:$0xff]  ;;  %v127_v7 = vld [vmem:[#allocation5 + $0x18] sm:$0xff]  ;;  %v128_v8 = vld [vmem:[#allocation5 + $0x20] sm:$0xff]  ;;  %s1557_s6 = smov [#allocation14]  }
  0x80   :  { %1126 = vmatpush3.msra.mxu1 %v1708_v1  ;;  %142 = vperm.xlu0 %1256, %v132_v5   ;;  %v133_v9 = vld [vmem:[#allocation7 + $0x8] sm:$0xff]  ;;  %v135_v10 = vld [vmem:[#allocation7 + $0x18] sm:$0xff]  ;;  %v130_v12 = vld [vmem:[#allocation5 + $0x30] sm:$0xff]  ;;  %s1021_s15 = sshll.u32 %s1557_s6, 4  ;;  %s1022_s15 = int_to_ptr.vmem [resolvable:$true] %s1021_s15 }
  0x81   :  { %1128 = vmatmul.mubr.msk.f32.vlgmr.msra.gmra.mrb[0].mxu1 %vm180_vm0, %v125_v3  ;;  %152 = vperm.xlu1 %1257, %v134_v6   ;;  %v129_v11 = vld [vmem:[#allocation5 + $0x28] sm:$0xff]  ;;  %v136_v13 = vld [vmem:[#allocation7 + $0x20] sm:$0xff]  ;;  %v131_v15 = vld [vmem:[#allocation5 + $0x38] sm:$0xff]  ;;  %s1491_s16 = scalar_lea.vmem %s1022_s15, 128  ;;  %p1496_p1 = scmp.lt.s32.totalorder %s1022_s15, %s1022_s15 }
  0x82   :  { %1130 = vmatprep.mubr.msk.f32.mxu1 %vm180_vm0, %v126_v4  ;;  %v137_v14 = vld [vmem:[#allocation7 + $0x28] sm:$0xff]  ;;  %v138_v16 = vld [vmem:[#allocation7 + $0x30] sm:$0xff]  ;;  %v139_v17 = vld [vmem:[#allocation7 + $0x38] sm:$0xff]  ;;  %p1492_p0 = scmp.ne.s32.totalorder %s1022_s15, %s1491_s16  ;;  %p1497_p2 = scmp.lt.s32.totalorder %s1491_s16, %s1491_s16 }
  0x83   :  { %v326_v18 = vld [vmem:[#allocation10] sm:$0xff]  ;;  %v327_v19 = vld [vmem:[#allocation10 + $0x8] sm:$0xff]  ;;  %v328_v20 = vld [vmem:[#allocation10 + $0x10] sm:$0xff] }
  0x84   :  { %147 = vperm.xlu0 %1256, %v133_v9   ;;  %v329_v21 = vld [vmem:[#allocation10 + $0x18] sm:$0xff]  ;;  %v330_v22 = vld [vmem:[#allocation10 + $0x20] sm:$0xff]  ;;  %v331_v23 = vld [vmem:[#allocation10 + $0x28] sm:$0xff]  ;;  %p1498_p3 = por %p1497_p2, %p1496_p1 }
  0x85   :  { %1131 = vmatmul.mubr.msk.f32.gmra.mrb[2].mxu1 %vm180_vm0, %v127_v7  ;;  %157 = vperm.xlu1 %1257, %v135_v10   ;;  %v332_v24 = vld [vmem:[#allocation10 + $0x30] sm:$0xff]  ;;  %v333_v25 = vld [vmem:[#allocation10 + $0x38] sm:$0xff]  ;;  %v528_v28 = vld [vmem:[#allocation13 + $0x10] sm:$0xff] }
  0x86   :  { %1133 = vmatprep.mubr.msk.f32.mxu1 %vm180_vm0, %v128_v8  ;;  %v526_v26 = vld [vmem:[#allocation13] sm:$0xff]  ;;  %v527_v27 = vld [vmem:[#allocation13 + $0x8] sm:$0xff]  ;;  %v529_v29 = vld [vmem:[#allocation13 + $0x18] sm:$0xff]  ;;  %p1499_p4 = pnand %p1498_p3, %p1492_p0 }
  0x87   :  { %v530_v30 = vld [vmem:[#allocation13 + $0x20] sm:$0xff]  ;;  %v531_v31 = vld [vmem:[#allocation13 + $0x28] sm:$0xff]  ;;  %v532_v32 = vld [vmem:[#allocation13 + $0x30] sm:$0xff] }
  0x88   :  { %162 = vperm.xlu0 %1256, %v136_v13   ;;  %v533_v33 = vld [vmem:[#allocation13 + $0x38] sm:$0xff]  ;;  %v534_v34 = vld [vmem:[#allocation13 + $0x40] sm:$0xff]  ;;  %v535_v35 = vld [vmem:[#allocation13 + $0x48] sm:$0xff] }
  0x89   :  { %1134 = vmatmul.mubr.msk.f32.gmra.mrb[4].mxu1 %vm180_vm0, %v129_v11  ;;  %167 = vperm.xlu1 %1257, %v137_v14   ;;  %v536_v36 = vld [vmem:[#allocation13 + $0x50] sm:$0xff]  ;;  %v537_v37 = vld [vmem:[#allocation13 + $0x58] sm:$0xff]  ;;  %v538_v38 = vld [vmem:[#allocation13 + $0x60] sm:$0xff] }
  0x8a   :  { %1136 = vmatprep.mubr.msk.f32.mxu1 %vm180_vm0, %v130_v12  ;;  %v539_v39 = vld [vmem:[#allocation13 + $0x68] sm:$0xff]  ;;  %v318_v40 = vld [vmem:[#allocation8] sm:$0xff] }
  0x8c   :  { %172 = vperm.xlu0 %1256, %v138_v16   ;;  %v320_v16 = vld [vmem:[#allocation8 + $0x10] sm:$0xff] }
  0x8d   :  { %1137 = vmatmul.mubr.msk.f32.gmra.mrb[6].mxu1 %vm180_vm0, %v131_v15  ;;  %177 = vperm.xlu1 %1257, %v139_v17   ;;  %v319_v15 = vld [vmem:[#allocation8 + $0x8] sm:$0xff]  ;;  %v321_v17 = vld [vmem:[#allocation8 + $0x18] sm:$0xff]  ;;  %vm1817_vm0 = vmand %vm923_vm14, %vm924_vm15 }
  0x8e   :  { %1155 = vmatprep.mubr.msk.f32.mxu1 %vm374_vm1, %v318_v40 }
  0x90   :  { %336 = vperm.xlu0 %1256, %v326_v18   ;;  %v322_v18 = vld [vmem:[#allocation8 + $0x20] sm:$0xff] }
  0x91   :  { %341 = vperm.xlu1 %1257, %v327_v19   ;;  %v323_v19 = vld [vmem:[#allocation8 + $0x28] sm:$0xff] }
  0x94   :  { %346 = vperm.xlu0 %1256, %v328_v20   ;;  %v324_v20 = vld [vmem:[#allocation8 + $0x30] sm:$0xff] }
  0x95   :  { %351 = vperm.xlu1 %1257, %v329_v21   ;;  %v325_v21 = vld [vmem:[#allocation8 + $0x38] sm:$0xff] }
  0x98   :  { %356 = vperm.xlu0 %1256, %v330_v22   ;;  %v512_v22 = vld [vmem:[#allocation11] sm:$0xff] }
  0x99   :  { %361 = vperm.xlu1 %1257, %v331_v23   ;;  %v524_v23 = vld [vmem:[#allocation11 + $0x60] sm:$0xff]  ;;  %1183 = vmatprep.mubr.msk.f32.mxu0 %vm374_vm1, %v512_v22 }
  0x9c   :  { %366 = vperm.xlu0 %1256, %v332_v24  }
  0x9d   :  { %371 = vperm.xlu1 %1257, %v333_v25  }
  0xa0   :  { %542 = vperm.xlu0 %1256, %v526_v26  }
  0xa1   :  { %547 = vperm.xlu1 %1257, %v527_v27  }
  0xa4   :  { %552 = vperm.xlu0 %1256, %v528_v28  }
  0xa5   :  { %557 = vperm.xlu1 %1257, %v529_v29  }
  0xa8   :  { %562 = vperm.xlu0 %1256, %v530_v30  }
  0xa9   :  { %567 = vperm.xlu1 %1257, %v531_v31  }
  0xac   :  { %572 = vperm.xlu0 %1256, %v532_v32  }
  0xad   :  { %577 = vperm.xlu1 %1257, %v533_v33  }
  0xb0   :  { %582 = vperm.xlu0 %1256, %v534_v34  }
  0xb1   :  { %587 = vperm.xlu1 %1257, %v535_v35  }
  0xb4   :  { %592 = vperm.xlu0 %1256, %v536_v36  }
  0xb5   :  { %597 = vperm.xlu1 %1257, %v537_v37  }
  0xb8   :  { %602 = vperm.xlu0 %1256, %v538_v38  }
  0xb9   :  { %607 = vperm.xlu1 %1257, %v539_v39  }
  0xff   :  { %v143_v41 = vpop.permute.xlu0 %142 }
 0x100   :  { %v153_v42 = vpop.permute.xlu1 %152 }
 0x103   :  { %v148_v43 = vpop.permute.xlu0 %147 }
 0x104   :  { %v158_v44 = vpop.permute.xlu1 %157 }
 0x107   :  { %v163_v54 = vpop.permute.xlu0 %162 }
 0x108   :  { %v168_v52 = vpop.permute.xlu1 %167 }
 0x10b   :  { %v173_v62 = vpop.permute.xlu0 %172 }
 0x10c   :  { %v178_v59 = vpop.permute.xlu1 %177 }
 0x10f   :  { %v337_v25 = vpop.permute.xlu0 %336 }
 0x110   :  { %v342_v24 = vpop.permute.xlu1 %341 }
 0x113   :  { %v347_v28 = vpop.permute.xlu0 %346 }
 0x114   :  { %v352_v26 = vpop.permute.xlu1 %351 }
 0x117   :  { %v357_v37 = vpop.permute.xlu0 %356 }
 0x118   :  { %v362_v35 = vpop.permute.xlu1 %361 }
 0x154   :  { %v1129_v45 = vpop.f32.mrb[0].mxu1 }
 0x155   :  { %v277_v46 = vadd.f32 %v1129_v45, %v148_v43  ;;  %v271_v47 = vpop.f32.mrb[1].mxu1  ;;  %v367_v45 = vpop.permute.xlu0 %366 }
 0x156   :  { %v272_v48 = vadd.f32 %v271_v47, %v143_v41 }
 0x157   :  { %1258 = vtanh.f32 %v277_v46 }
 0x158   :  { %1260 = vtanh.f32 %v272_v48  ;;  %v1132_v49 = vpop.f32.mrb[2].mxu1 }
 0x159   :  { %v287_v50 = vadd.f32 %v1132_v49, %v158_v44  ;;  %v281_v51 = vpop.f32.mrb[3].mxu1 }
 0x15a   :  { %v282_v53 = vadd.f32 %v281_v51, %v153_v42  ;;  %v372_v42 = vpop.permute.xlu1 %371 }
 0x15b   :  { %1262 = vtanh.f32 %v287_v50 }
 0x15c   :  { %1264 = vtanh.f32 %v282_v53  ;;  %v1135_v55 = vpop.f32.mrb[4].mxu1 }
 0x15d   :  { %v297_v56 = vadd.f32 %v1135_v55, %v168_v52  ;;  %v291_v57 = vpop.f32.mrb[5].mxu1 }
 0x15e   :  { %v292_v58 = vadd.f32 %v291_v57, %v163_v54 }
 0x15f   :  { %1266 = vtanh.f32 %v297_v56 }
 0x160   :  { %1268 = vtanh.f32 %v292_v58  ;;  %v1138_v60 = vpop.f32.mrb[6].mxu1 }
 0x161   :  { %v1259_v61 = vpop.eup %1258  ;;  %v307_v63 = vadd.f32 %v1138_v60, %v178_v59  ;;  %v301_v2 = vpop.f32.mrb[7].mxu1  ;;  %v513_v60 = vld [vmem:[#allocation11 + $0x8] sm:$0xff] }
 0x162   :  { %v1261_v3 = vpop.eup %1260  ;;  %v302_v4 = vadd.f32 %v301_v2, %v173_v62  ;;  %v514_v62 = vld [vmem:[#allocation11 + $0x10] sm:$0xff]  ;;  %v516_v2 = vld [vmem:[#allocation11 + $0x20] sm:$0xff] }
 0x163   :  { %1270 = vtanh.f32 %v307_v63  ;;  %v1204_v5 = vpack.c.bf16 %v1259_v61, %v1261_v3  ;;  %v525_v61 = vld [vmem:[#allocation11 + $0x68] sm:$0xff]  ;;  %v515_v63 = vld [vmem:[#allocation11 + $0x18] sm:$0xff] }
 0x164   :  { %1272 = vtanh.f32 %v302_v4  ;;  %v517_v3 = vld [vmem:[#allocation11 + $0x28] sm:$0xff]  ;;  %v518_v4 = vld [vmem:[#allocation11 + $0x30] sm:$0xff] }
 0x165   :  { %v1263_v6 = vpop.eup %1262  ;;  %1205 = vmatprep.subr.bf16.mxu1 %v1204_v5 }
 0x166   :  { %v1265_v7 = vpop.eup %1264  ;;  %1207 = vmatpush3.bf16.msra.mxu1 %v1204_v5  ;;  %v519_v5 = vld [vmem:[#allocation11 + $0x38] sm:$0xff] }
 0x167   :  { %v1208_v8 = vpack.c.bf16 %v1263_v6, %v1265_v7  ;;  %v520_v6 = vld [vmem:[#allocation11 + $0x40] sm:$0xff]  ;;  %v521_v7 = vld [vmem:[#allocation11 + $0x48] sm:$0xff] }
 0x169   :  { %v1267_v9 = vpop.eup %1266  ;;  %1209 = vmatprep.subr.bf16.mxu1 %v1208_v8 }
 0x16a   :  { %v1269_v10 = vpop.eup %1268  ;;  %1211 = vmatpush3.bf16.msra.mxu1 %v1208_v8  ;;  %v522_v8 = vld [vmem:[#allocation11 + $0x50] sm:$0xff] }
 0x16b   :  { %v1212_v11 = vpack.c.bf16 %v1267_v9, %v1269_v10  ;;  %v523_v9 = vld [vmem:[#allocation11 + $0x58] sm:$0xff]  ;;  %v548_v10 = vpop.permute.xlu1 %547 }
 0x16d   :  { %v1271_v12 = vpop.eup %1270  ;;  %1213 = vmatprep.subr.bf16.mxu1 %v1212_v11 }
 0x16e   :  { %v1273_v13 = vpop.eup %1272  ;;  %1215 = vmatpush3.bf16.msra.mxu1 %v1212_v11  ;;  %v543_v11 = vpop.permute.xlu0 %542 }
 0x16f   :  { %v1216_v14 = vpack.c.bf16 %v1271_v12, %v1273_v13  ;;  %v558_v12 = vpop.permute.xlu1 %557 }
 0x171   :  { %1217 = vmatprep.subr.bf16.mxu1 %v1216_v14 }
 0x172   :  { %1219 = vmatpush3.bf16.msra.mxu1 %v1216_v14  ;;  %v553_v13 = vpop.permute.xlu0 %552 }
 0x173   :  { %v568_v14 = vpop.permute.xlu1 %567 }
 0x175   :  { %1156 = vmatmul.mubr.msk.f32.vlgmr.msra.gmra.mrb[8].mxu1 %vm374_vm1, %v319_v15 }
 0x176   :  { %1158 = vmatprep.mubr.msk.f32.mxu1 %vm374_vm1, %v320_v16  ;;  %v563_v15 = vpop.permute.xlu0 %562 }
 0x177   :  { %v578_v16 = vpop.permute.xlu1 %577 }
 0x179   :  { %1159 = vmatmul.mubr.msk.f32.gmra.mrb[10].mxu1 %vm374_vm1, %v321_v17 }
 0x17a   :  { %1161 = vmatprep.mubr.msk.f32.mxu1 %vm374_vm1, %v322_v18  ;;  %v573_v17 = vpop.permute.xlu0 %572 }
 0x17b   :  { %v588_v18 = vpop.permute.xlu1 %587 }
 0x17d   :  { %1162 = vmatmul.mubr.msk.f32.gmra.mrb[12].mxu1 %vm374_vm1, %v323_v19 }
 0x17e   :  { %1164 = vmatprep.mubr.msk.f32.mxu1 %vm374_vm1, %v324_v20  ;;  %v583_v19 = vpop.permute.xlu0 %582 }
 0x181   :  { %1165 = vmatmul.mubr.msk.f32.gmra.mrb[14].mxu1 %vm374_vm1, %v325_v21 }
 0x182   :  { %1201 = vmatprep.mubr.msk.f32.mxu1 %vm374_vm1, %v524_v23 }
 0x248   :  { %v1157_v27 = vpop.f32.mrb[8].mxu1 }
 0x249   :  { %v471_v29 = vadd.f32 %v1157_v27, %v342_v24  ;;  %v465_v30 = vpop.f32.mrb[9].mxu1 }
 0x24a   :  { %v466_v31 = vadd.f32 %v465_v30, %v337_v25  ;;  %v598_v25 = vpop.permute.xlu1 %597 }
 0x24b   :  { %1274 = vtanh.f32 %v471_v29  ;;  %v593_v29 = vpop.permute.xlu0 %592 }
 0x24c   :  { %1276 = vtanh.f32 %v466_v31  ;;  %v1160_v32 = vpop.f32.mrb[10].mxu1 }
 0x24d   :  { %v481_v33 = vadd.f32 %v1160_v32, %v352_v26  ;;  %v475_v34 = vpop.f32.mrb[11].mxu1 }
 0x24e   :  { %v476_v36 = vadd.f32 %v475_v34, %v347_v28  ;;  %v608_v32 = vpop.permute.xlu1 %607 }
 0x24f   :  { %1278 = vtanh.f32 %v481_v33 }
 0x250   :  { %1280 = vtanh.f32 %v476_v36  ;;  %v1163_v38 = vpop.f32.mrb[12].mxu1 }
 0x251   :  { %v491_v39 = vadd.f32 %v1163_v38, %v362_v35  ;;  %v485_v40 = vpop.f32.mrb[13].mxu1 }
 0x252   :  { %v486_v41 = vadd.f32 %v485_v40, %v357_v37  ;;  %v603_v40 = vpop.permute.xlu0 %602 }
 0x253   :  { %1282 = vtanh.f32 %v491_v39 }
 0x254   :  { %1284 = vtanh.f32 %v486_v41  ;;  %v1166_v43 = vpop.f32.mrb[14].mxu1 }
 0x255   :  { %v1275_v44 = vpop.eup %1274  ;;  %v501_v46 = vadd.f32 %v1166_v43, %v372_v42  ;;  %v495_v47 = vpop.f32.mrb[15].mxu1 }
 0x256   :  { %v1277_v48 = vpop.eup %1276  ;;  %v496_v49 = vadd.f32 %v495_v47, %v367_v45 }
 0x257   :  { %1286 = vtanh.f32 %v501_v46  ;;  %v1220_v50 = vpack.c.bf16 %v1275_v44, %v1277_v48 }
 0x258   :  { %1288 = vtanh.f32 %v496_v49 }
 0x259   :  { %v1279_v51 = vpop.eup %1278  ;;  %1221 = vmatprep.subr.bf16.mxu0 %v1220_v50  ;;  %1236 = vmatprep.subr.bf16.mxu1 %v1220_v50 }
 0x25a   :  { %v1281_v52 = vpop.eup %1280  ;;  %1223 = vmatpush3.bf16.msra.mxu0 %v1220_v50  ;;  %1240 = vmatpush3.bf16.msra.mxu1 %v1220_v50 }
 0x25b   :  { %v1224_v53 = vpack.c.bf16 %v1279_v51, %v1281_v52 }
 0x25d   :  { %v1283_v54 = vpop.eup %1282  ;;  %1225 = vmatprep.subr.bf16.mxu0 %v1224_v53  ;;  %1237 = vmatprep.subr.bf16.mxu1 %v1224_v53 }
 0x25e   :  { %v1285_v55 = vpop.eup %1284  ;;  %1227 = vmatpush3.bf16.msra.mxu0 %v1224_v53  ;;  %1241 = vmatpush3.bf16.msra.mxu1 %v1224_v53 }
 0x25f   :  { %v1228_v56 = vpack.c.bf16 %v1283_v54, %v1285_v55 }
 0x261   :  { %v1287_v57 = vpop.eup %1286  ;;  %1229 = vmatprep.subr.bf16.mxu0 %v1228_v56  ;;  %1238 = vmatprep.subr.bf16.mxu1 %v1228_v56 }
 0x262   :  { %v1289_v58 = vpop.eup %1288  ;;  %1231 = vmatpush3.bf16.msra.mxu0 %v1228_v56  ;;  %1242 = vmatpush3.bf16.msra.mxu1 %v1228_v56 }
 0x263   :  { %v1232_v59 = vpack.c.bf16 %v1287_v57, %v1289_v58 }
 0x265   :  { %1233 = vmatprep.subr.bf16.mxu0 %v1232_v59  ;;  %1239 = vmatprep.subr.bf16.mxu1 %v1232_v59 }
 0x266   :  { %1235 = vmatpush3.bf16.msra.mxu0 %v1232_v59  ;;  %1243 = vmatpush3.bf16.msra.mxu1 %v1232_v59 }
 0x269   :  { %1184 = vmatmul.mubr.msk.f32.vlgmr.msra.gmra.mrb[0].mxu0 %vm374_vm1, %v513_v60  ;;  %1202 = vmatmul.mubr.msk.f32.vlgmr.msra.gmra.mrb[16].mxu1 %vm374_vm1, %v525_v61 }
 0x26a   :  { %1186 = vmatprep.mubr.msk.f32.mxu0 %vm374_vm1, %v514_v62 }
 0x26d   :  { %1187 = vmatmul.mubr.msk.f32.gmra.mrb[2].mxu0 %vm374_vm1, %v515_v63 }
 0x26e   :  { %1189 = vmatprep.mubr.msk.f32.mxu0 %vm374_vm1, %v516_v2 }
 0x271   :  { %1190 = vmatmul.mubr.msk.f32.gmra.mrb[4].mxu0 %vm374_vm1, %v517_v3 }
 0x272   :  { %1192 = vmatprep.mubr.msk.f32.mxu0 %vm374_vm1, %v518_v4 }
 0x275   :  { %1193 = vmatmul.mubr.msk.f32.gmra.mrb[6].mxu0 %vm374_vm1, %v519_v5 }
 0x276   :  { %1195 = vmatprep.mubr.msk.f32.mxu0 %vm374_vm1, %v520_v6 }
 0x279   :  { %1196 = vmatmul.mubr.msk.f32.gmra.mrb[8].mxu0 %vm374_vm1, %v521_v7 }
 0x27a   :  { %1198 = vmatprep.mubr.msk.f32.mxu0 %vm374_vm1, %v522_v8 }
 0x27d   :  { %1199 = vmatmul.mubr.msk.f32.gmra.mrb[10].mxu0 %vm374_vm1, %v523_v9 }
 0x33c   :  { %v1185_v20 = vpop.f32.mrb[0].mxu0  ;;  %v1203_v21 = vpop.f32.mrb[16].mxu1 }
 0x33d   :  { %v724_v22 = vadd.f32 %v1185_v20, %v548_v10  ;;  %v718_v23 = vpop.f32.mrb[1].mxu0  ;;  %v778_v24 = vpop.f32.mrb[17].mxu1  ;;  %v1742_v36 = vadd.f32 %v1203_v21, %v608_v32 }
 0x33e   :  { %v719_v26 = vadd.f32 %v718_v23, %v543_v11  ;;  %v1744_v41 = vadd.f32 %v778_v24, %v603_v40 }
 0x33f   :  { %v914_v44 = vand.u32 2147483647, %v1742_v36 }
 0x340   :  { %v787_v27 = vmax.f32 %v719_v26, %v724_v22  ;;  %v1188_v28 = vpop.f32.mrb[2].mxu0  ;;  %v904_v53 = vand.u32 2147483647, %v1744_v41 }
 0x341   :  { %v728_v30 = vpop.f32.mrb[3].mxu0  ;;  %v734_v33 = vadd.f32 %v1188_v28, %v558_v12  ;;  %v915_v60 = vsub.f32 0.0, %v914_v44 }
 0x342   :  { %v729_v31 = vadd.f32 %v728_v30, %v553_v13  ;;  %v905_v3 = vsub.f32 0.0, %v904_v53 }
 0x343   :  { %v916_v11 = vmul.f32 1.442695, %v915_v60 }
 0x344   :  { %v788_v34 = vmax.f32 %v787_v27, %v729_v31  ;;  %v1191_v35 = vpop.f32.mrb[4].mxu0 }
 0x345   :  { %v738_v37 = vpop.f32.mrb[5].mxu0  ;;  %v744_v50 = vadd.f32 %v1191_v35, %v568_v14  ;;  %v906_v14 = vmul.f32 1.442695, %v905_v3 }
 0x346   :  { %v739_v38 = vadd.f32 %v738_v37, %v563_v15  ;;  %v789_v39 = vmax.f32 %v788_v34, %v734_v33 }
 0x348   :  { %v790_v42 = vmax.f32 %v789_v39, %v739_v38  ;;  %v1194_v43 = vpop.f32.mrb[6].mxu0 }
 0x349   :  { %v748_v45 = vpop.f32.mrb[7].mxu0  ;;  %v754_v57 = vadd.f32 %v1194_v43, %v578_v16 }
 0x34a   :  { %v791_v46 = vsub.f32 %v719_v26, %v790_v42  ;;  %v794_v47 = vsub.f32 %v724_v22, %v790_v42  ;;  %v797_v48 = vsub.f32 %v729_v31, %v790_v42  ;;  %v800_v49 = vsub.f32 %v734_v33, %v790_v42 }
 0x34b   :  { %v803_v51 = vsub.f32 %v739_v38, %v790_v42  ;;  %v749_v52 = vadd.f32 %v748_v45, %v573_v17 }
 0x34c   :  { %v792_v54 = vmul.f32 1.442695, %v791_v46  ;;  %v795_v55 = vmul.f32 1.442695, %v794_v47  ;;  %v798_v56 = vmul.f32 1.442695, %v797_v48 }
 0x34d   :  { %v824_v58 = vmax.f32 %v744_v50, %v749_v52  ;;  %v1197_v59 = vpop.f32.mrb[8].mxu0  ;;  %v801_v62 = vmul.f32 1.442695, %v800_v49  ;;  %v804_v4 = vmul.f32 1.442695, %v803_v51 }
 0x34e   :  { %1290 = vpow2.f32 %v792_v54  ;;  %v758_v61 = vpop.f32.mrb[9].mxu0  ;;  %v764_v6 = vadd.f32 %v1197_v59, %v588_v18 }
 0x34f   :  { %1292 = vpow2.f32 %v795_v55  ;;  %v759_v63 = vadd.f32 %v758_v61, %v583_v19  ;;  %v825_v2 = vmax.f32 %v824_v58, %v754_v57 }
 0x350   :  { %v1200_v5 = vpop.f32.mrb[10].mxu0  ;;  %1294 = vpow2.f32 %v798_v56 }
 0x351   :  { %v826_v7 = vmax.f32 %v825_v2, %v759_v63  ;;  %v1748_v8 = vadd.f32 %v1200_v5, %v598_v25  ;;  %v768_v9 = vpop.f32.mrb[11].mxu0  ;;  %1296 = vpow2.f32 %v801_v62 }
 0x352   :  { %v1750_v10 = vadd.f32 %v768_v9, %v593_v29  ;;  %1298 = vpow2.f32 %v804_v4 }
 0x353   :  { %v827_v12 = vmax.f32 %v826_v7, %v764_v6  ;;  %v894_v13 = vand.u32 2147483647, %v1748_v8  ;;  %1300 = vpow2.f32 %v916_v11 }
 0x354   :  { %v884_v15 = vand.u32 2147483647, %v1750_v10  ;;  %1302 = vpow2.f32 %v906_v14 }
 0x355   :  { %v828_v16 = vsub.f32 %v744_v50, %v827_v12  ;;  %v831_v17 = vsub.f32 %v749_v52, %v827_v12  ;;  %v834_v19 = vsub.f32 %v754_v57, %v827_v12  ;;  %v837_v20 = vsub.f32 %v759_v63, %v827_v12 }
 0x356   :  { %v840_v18 = vsub.f32 %v764_v6, %v827_v12  ;;  %v895_v21 = vsub.f32 0.0, %v894_v13  ;;  %v885_v24 = vsub.f32 0.0, %v884_v15  ;;  %v1755_v13 = vclamps-f32 %v1708_v1, 5.0 }
 0x357   :  { %v829_v22 = vmul.f32 1.442695, %v828_v16  ;;  %v832_v23 = vmul.f32 1.442695, %v831_v17  ;;  %v835_v26 = vmul.f32 1.442695, %v834_v19 }
 0x358   :  { %v1291_v25 = vpop.eup %1290  ;;  %v838_v28 = vmul.f32 1.442695, %v837_v20  ;;  %v896_v30 = vmul.f32 1.442695, %v895_v21  ;;  %v886_v32 = vmul.f32 1.442695, %v885_v24 }
 0x359   :  { %v1293_v27 = vpop.eup %1292  ;;  %1304 = vpow2.f32 %v829_v22  ;;  %v841_v34 = vmul.f32 1.442695, %v840_v18  ;;  %vm939_vm2 = vcmp.ge.f32.partialorder %v1755_v13, 5.000001 }
 0x35a   :  { %v806_v29 = vadd.f32 %v1293_v27, %v1291_v25  ;;  %1306 = vpow2.f32 %v832_v23  ;;  %v1295_v31 = vpop.eup %1294 }
 0x35b   :  { %1308 = vpow2.f32 %v835_v26  ;;  %v1297_v35 = vpop.eup %1296 }
 0x35c   :  { %v807_v33 = vadd.f32 %v1295_v31, %v806_v29  ;;  %1310 = vpow2.f32 %v838_v28  ;;  %v1299_v37 = vpop.eup %1298 }
 0x35d   :  { %1312 = vpow2.f32 %v896_v30  ;;  %v1301_v40 = vpop.eup %1300 }
 0x35e   :  { %v808_v38 = vadd.f32 %v1297_v35, %v807_v33  ;;  %1314 = vpow2.f32 %v886_v32  ;;  %v1303_v42 = vpop.eup %1302  ;;  %v918_v47 = vadd.f32 1.0, %v1301_v40 }
 0x35f   :  { %1316 = vpow2.f32 %v841_v34  ;;  %v908_v49 = vadd.f32 1.0, %v1303_v42 }
 0x360   :  { %v809_v39 = vadd.f32 %v1299_v37, %v808_v38 }
 0x362   :  { %1318 = vrcp.f32 %v809_v39 }
 0x363   :  { %v1305_v43 = vpop.eup %1304  ;;  %1320 = vlog2.f32 %v918_v47 }
 0x364   :  { %v1307_v44 = vpop.eup %1306  ;;  %1322 = vlog2.f32 %v908_v49 }
 0x365   :  { %v843_v45 = vadd.f32 %v1307_v44, %v1305_v43  ;;  %v1309_v46 = vpop.eup %1308 }
 0x366   :  { %v1311_v48 = vpop.eup %1310 }
 0x367   :  { %v844_v50 = vadd.f32 %v1309_v46, %v843_v45  ;;  %v1313_v51 = vpop.eup %1312 }
 0x368   :  { %v1315_v52 = vpop.eup %1314  ;;  %v898_v54 = vadd.f32 1.0, %v1313_v51  ;;  %v903_v51 = vmax.f32 %v1744_v41, 0.0 }
 0x369   :  { %v845_v53 = vadd.f32 %v1311_v48, %v844_v50  ;;  %v1317_v55 = vpop.eup %1316  ;;  %v888_v58 = vadd.f32 1.0, %v1315_v52  ;;  %v913_v50 = vmax.f32 %v1742_v36, 0.0  ;;  %v893_v52 = vmax.f32 %v1748_v8, 0.0 }
 0x36a   :  { %1324 = vlog2.f32 %v898_v54 }
 0x36b   :  { %v846_v56 = vadd.f32 %v1317_v55, %v845_v53  ;;  %v883_v53 = vmax.f32 %v1750_v10, 0.0 }
 0x36c   :  { %v1319_v57 = vpop.eup %1318 }
 0x36d   :  { %v812_v59 = vmul.f32 %v1319_v57, %v1291_v25  ;;  %v813_v60 = vmul.f32 %v1319_v57, %v1293_v27  ;;  %v814_v61 = vmul.f32 %v1319_v57, %v1295_v31  ;;  %v815_v62 = vmul.f32 %v1319_v57, %v1297_v35  ;;  %v1321_v12 = vpop.eup %1320 }
 0x36e   :  { %1326 = vrcp.f32 %v846_v56  ;;  %v1323_v14 = vpop.eup %1322  ;;  %v940_v27 = vsel %vm939_vm2, 1, %v1556_v0  ;;  %v920_v29 = vmul.f32 0.6931472, %v1321_v12 }
 0x36f   :  { %v816_v63 = vmul.f32 0.995, %v812_v59  ;;  %v818_v2 = vmul.f32 0.995, %v813_v60  ;;  %v820_v3 = vmul.f32 0.995, %v814_v61  ;;  %1328 = vlog2.f32 %v888_v58 }
 0x370   :  { %v822_v6 = vmul.f32 0.995, %v815_v62  ;;  %v910_v30 = vmul.f32 0.6931472, %v1323_v14  ;;  %v921_v56 = vadd.f32 %v920_v29, %v913_v50 }
 0x371   :  { %v817_v4 = vadd.f32 0.001, %v816_v63  ;;  %v819_v5 = vadd.f32 0.001, %v818_v2  ;;  %v821_v7 = vadd.f32 0.001, %v820_v3 }
 0x372   :  { %v823_v15 = vadd.f32 0.001, %v822_v6  ;;  %v911_v57 = vadd.f32 %v910_v30, %v903_v51  ;;  %v922_v2 = vadd.f32 0.001, %v921_v56 }
 0x373   :  { %v865_v9 = vadd.f32 %v819_v5, %v817_v4  ;;  %v861_v11 = vmul.f32 10.0, %v817_v4 }
 0x374   :  { %v1325_v20 = vpop.eup %1324  ;;  %v912_v8 = vadd.f32 0.001, %v911_v57 }
 0x375   :  { %v1757_v16 = vadd.f32 -5.0, %v861_v11  ;;  %v867_v17 = vmul.f32 10.0, %v865_v9  ;;  %v871_v19 = vadd.f32 %v865_v9, %v821_v7  ;;  %v900_v32 = vmul.f32 0.6931472, %v1325_v20 }
 0x377   :  { %v1760_v18 = vadd.f32 -5.0, %v867_v17  ;;  %v873_v21 = vmul.f32 10.0, %v871_v19  ;;  %v877_v22 = vadd.f32 %v871_v19, %v823_v15  ;;  %vm928_vm3 = vcmp.ge.f32.partialorder %v1755_v13, %v1757_v16 }
 0x378   :  { %v1327_v23 = vpop.eup %1326  ;;  %v929_v34 = vsel %vm928_vm3, 1, %v1556_v0  ;;  %v901_v58 = vadd.f32 %v900_v32, %v893_v52 }
 0x379   :  { %v852_v24 = vmul.f32 %v1327_v23, %v1311_v48  ;;  %v1764_v25 = vadd.f32 -5.0, %v873_v21  ;;  %v879_v26 = vmul.f32 10.0, %v877_v22  ;;  %v1329_v28 = vpop.eup %1328  ;;  %vm930_vm4 = vcmp.ge.f32.partialorder %v1755_v13, %v1760_v18 }
 0x37a   :  { %v849_v31 = vmul.f32 %v1327_v23, %v1305_v43  ;;  %v931_v35 = vsel %vm930_vm4, 1, %v1556_v0  ;;  %v850_v38 = vmul.f32 %v1327_v23, %v1307_v44  ;;  %v851_v39 = vmul.f32 %v1327_v23, %v1309_v46 }
 0x37b   :  { %v1769_v33 = vadd.f32 -5.0, %v879_v26  ;;  %v932_v37 = vadd.s32 %v931_v35, %v929_v34  ;;  %vm933_vm5 = vcmp.ge.f32.partialorder %v1755_v13, %v1764_v25  ;;  %v890_v40 = vmul.f32 0.6931472, %v1329_v28 }
 0x37c   :  { %v934_v42 = vsel %vm933_vm5, 1, %v1556_v0  ;;  %v853_v43 = vmul.f32 0.995, %v849_v31  ;;  %v855_v48 = vmul.f32 0.995, %v850_v38 }
 0x37d   :  { %vm936_vm6 = vcmp.ge.f32.partialorder %v1755_v13, %v1769_v33  ;;  %v935_v45 = vadd.s32 %v934_v42, %v932_v37  ;;  %v857_v49 = vmul.f32 0.995, %v851_v39  ;;  %v859_v46 = vmul.f32 0.995, %v852_v24 }
 0x37e   :  { %v937_v47 = vsel %vm936_vm6, 1, %v1556_v0  ;;  %v854_v44 = vadd.f32 0.001, %v853_v43  ;;  %v856_v55 = vadd.f32 0.001, %v855_v48  ;;  %v891_v59 = vadd.f32 %v890_v40, %v883_v53 }
 0x37f   :  { %v938_v54 = vadd.s32 %v937_v47, %v935_v45  ;;  %v858_v0 = vadd.f32 0.001, %v857_v49  ;;  %v860_v63 = vadd.f32 0.001, %v859_v46  ;;  %v902_v4 = vadd.f32 0.001, %v901_v58 }
 0x380   :  { %v866_v61 = vadd.f32 %v856_v55, %v854_v44  ;;  %v863_v62 = vmul.f32 10.0, %v854_v44  ;;  %v892_v5 = vadd.f32 0.001, %v891_v59 }
 0x381   :  { %v941_v60 = vadd.s32 %v940_v27, %v938_v54 }
 0x382   :  { %v869_v36 = vmul.f32 10.0, %v866_v61  ;;  %v872_v41 = vadd.f32 %v866_v61, %v858_v0  ;;  %v864_v7 = vadd.f32 -5.0, %v863_v62 }
 0x383   :  { %vm942_vm7 = vcmp.gt.s32.totalorder %v941_v60, 0 }
 0x384   :  { %v943_v3 = vsel %vm942_vm7, %v941_v60, 0  ;;  %v878_v10 = vadd.f32 %v872_v41, %v860_v63  ;;  %v870_v9 = vadd.f32 -5.0, %v869_v36  ;;  %v875_v11 = vmul.f32 10.0, %v872_v41 }
 0x385   :  { %vm944_vm8 = vcmp.lt.s32.totalorder %v943_v3, 4 }
 0x386   :  { %v945_v6 = vsel %vm944_vm8, %v943_v3, 4  ;;  %v876_v31 = vadd.f32 -5.0, %v875_v11  ;;  %v881_v34 = vmul.f32 10.0, %v878_v10 }
 0x387   :  { %vm946_vm9 = vcmp.eq.s32.totalorder %v945_v6, 1  ;;  %vm949_vm10 = vcmp.eq.s32.totalorder %v945_v6, 2  ;;  %vm952_vm11 = vcmp.eq.s32.totalorder %v945_v6, 3  ;;  %vm955_vm12 = vcmp.eq.s32.totalorder %v945_v6, 4 }
 0x388   :  { %v947_v12 = vsel %vm946_vm9, %v1760_v18, %v1757_v16  ;;  %v958_v14 = vsel %vm946_vm9, %v1757_v16, -5.0  ;;  %v960_v15 = vsel %vm946_vm9, %v892_v5, 1.0  ;;  %vm961_vm13 = vcmp.eq.s32.totalorder %v945_v6, 0 }
 0x389   :  { %v950_v17 = vsel %vm949_vm10, %v1764_v25, %v947_v12  ;;  %v962_v19 = vsel %vm961_vm13, %v892_v5, 1.0  ;;  %v963_v20 = vsel %vm949_vm10, %v1760_v18, %v958_v14  ;;  %v965_v21 = vsel %vm949_vm10, %v902_v4, %v960_v15 }
 0x38a   :  { %v953_v22 = vsel %vm952_vm11, %v1769_v33, %v950_v17  ;;  %v966_v23 = vsel %vm946_vm9, %v902_v4, %v962_v19  ;;  %v967_v16 = vsel %vm952_vm11, %v1764_v25, %v963_v20  ;;  %v969_v24 = vsel %vm952_vm11, %v912_v8, %v965_v21 }
 0x38b   :  { %v956_v26 = vsel %vm955_vm12, 5.0, %v953_v22  ;;  %v970_v27 = vsel %vm949_vm10, %v912_v8, %v966_v23  ;;  %v971_v28 = vsel %vm955_vm12, %v1769_v33, %v967_v16  ;;  %v973_v18 = vsel %vm955_vm12, %v922_v2, %v969_v24 }
 0x38c   :  { %v974_v29 = vsel %vm952_vm11, %v922_v2, %v970_v27  ;;  %v975_v30 = vsub.f32 %v956_v26, %v971_v28  ;;  %v948_v35 = vsel %vm946_vm9, %v870_v9, %v864_v7  ;;  %v959_v25 = vsel %vm946_vm9, %v864_v7, -5.0  ;;  %v1336_v7 = vld [vmem:[#allocation2] sm:$0xff] }
 0x38d   :  { %v989_v32 = vadd.f32 %v974_v29, %v973_v18  ;;  %v951_v37 = vsel %vm949_vm10, %v876_v31, %v948_v35  ;;  %v964_v38 = vsel %vm949_vm10, %v870_v9, %v959_v25  ;;  %v882_v39 = vadd.f32 -5.0, %v881_v34 }
 0x38e   :  { %1330 = vrcp.f32 %v975_v30  ;;  %v968_v33 = vsel %vm952_vm11, %v876_v31, %v964_v38  ;;  %v980_v47 = vsub.f32 %v1755_v13, %v971_v28 }
 0x38f   :  { %v954_v40 = vsel %vm952_vm11, %v882_v39, %v951_v37  ;;  %v972_v42 = vsel %vm955_vm12, %v882_v39, %v968_v33 }
 0x390   :  { %v957_v43 = vsel %vm955_vm12, 5.0, %v954_v40 }
 0x391   :  { %v976_v45 = vsub.f32 %v957_v43, %v972_v42 }
 0x398   :  { %v1331_v48 = vpop.eup %1330 }
 0x399   :  { %v981_v49 = vmul.f32 %v1331_v48, %v980_v47  ;;  %v979_v50 = vmul.f32 %v1331_v48, %v976_v45 }
 0x39b   :  { %v982_v51 = vsub.f32 1.0, %v981_v49  ;;  %v999_v52 = vmul.f32 %v981_v49, %v974_v29  ;;  %v984_v44 = vmul.f32 %v981_v49, %v979_v50  ;;  %v990_v46 = vmul.f32 2.0, %v979_v50 }
 0x39c   :  { %v998_v36 = vmul.f32 %v979_v50, %v979_v50 }
 0x39d   :  { %v1000_v53 = vmul.f32 %v999_v52, %v981_v49  ;;  %v1003_v54 = vmul.f32 %v982_v51, %v973_v18  ;;  %v983_v55 = vmul.f32 %v982_v51, %v981_v49  ;;  %v985_v56 = vmul.f32 %v984_v44, %v981_v49 }
 0x39e   :  { %v991_v57 = vsub.f32 %v989_v32, %v990_v46 }
 0x39f   :  { %v986_v58 = vmul.f32 %v983_v55, %v973_v18  ;;  %v1001_v59 = vmul.f32 %v990_v46, %v983_v55  ;;  %v1004_v60 = vmul.f32 %v1003_v54, %v982_v51 }
 0x3a0   :  { %v992_v0 = vmul.f32 %v991_v57, %v983_v55 }
 0x3a1   :  { %v987_v61 = vadd.f32 %v986_v58, %v985_v56  ;;  %v1002_v62 = vadd.f32 %v1001_v59, %v1000_v53 }
 0x3a2   :  { %v993_v63 = vadd.f32 %v992_v0, %v979_v50 }
 0x3a3   :  { %v988_v13 = vmul.f32 %v987_v61, %v976_v45  ;;  %v1005_v41 = vadd.f32 %v1004_v60, %v1002_v62 }
 0x3a4   :  { %1332 = vrcp.f32 %v993_v63 }
 0x3a5   :  { %v1006_v2 = vmul.f32 %v1005_v41, %v998_v36 }
 0x3ae   :  { %v1333_v8 = vpop.eup %1332 }
 0x3af   :  { %v996_v3 = vmul.f32 %v1333_v8, %v988_v13  ;;  %v1007_v4 = vmul.f32 %v1333_v8, %v1006_v2 }
 0x3b1   :  { %v997_v10 = vadd.f32 %v996_v3, %v972_v42  ;;  %v1008_v6 = vmul.f32 %v1333_v8, %v1007_v4 }
 0x3b3   :  { %v1011_v9 = vsel %vm1817_vm0, %v997_v10, %v1336_v7  ;;  %1334 = vlog2.f32 %v1008_v6 }
 0x3b4   :  { %1012 = vst [vmem:[#allocation14] sm:$0xff] %v1011_v9 }
 0x3b5   :  { %1502 = shalt.err (!%p1499_p4)
}
 0x3b6   :  { %s1503_s21 = scalar_lea.hbm %s1856_s7, 128 }
 0x3b7   :  { %p1504_p5 = scmp.ne.s32.totalorder %s1856_s7, %s1503_s21  ;;  %p1507_p6 = scmp.lt.u32.totalorder %s1503_s21, %s1856_s7 }
 0x3b9   :  { %p1509_p7 = pnand %p1507_p6, %p1504_p5 }
 0x3bb   :  { %1512 = shalt.err (!%p1509_p7)
}
 0x3bc   :  { %1024 = dma.vmem_to_hbm [thread:$0]  %s1022_s15, 128, %s1856_s7, [#allocation4]  }
 0x3bd   :  { %s1558_s1 = smov [#allocation15]   ;;  %v1335_v1 = vpop.eup %1334 }
 0x3be   :  { %s1031_s28 = sshll.u32 %s1558_s1, 4  ;;  %v1010_v11 = vmul.f32 0.6931472, %v1335_v1  ;;  %s1032_s28 = int_to_ptr.vmem [resolvable:$true] %s1031_s28 }
 0x3bf   :  { %s1513_s9 = scalar_lea.vmem %s1032_s28, 128  ;;  %p1518_p9 = scmp.lt.s32.totalorder %s1032_s28, %s1032_s28 }
 0x3c0   :  { %v1013_v12 = vsel %vm1817_vm0, %v1010_v11, 0.0  ;;  %p1514_p8 = scmp.ne.s32.totalorder %s1032_s28, %s1513_s9  ;;  %p1519_p10 = scmp.lt.s32.totalorder %s1513_s9, %s1513_s9 }
 0x3c1   :  { %1014 = vst [vmem:[#allocation15] sm:$0xff] %v1013_v12 }
 0x3c2   :  { %p1520_p11 = por %p1519_p10, %p1518_p9 }
 0x3c4   :  { %p1521_p12 = pnand %p1520_p11, %p1514_p8 }
 0x3c6   :  { %1524 = shalt.err (!%p1521_p12)
}
 0x3c7   :  { %s1525_s7 = scalar_lea.hbm %s1857_s8, 128 }
 0x3c8   :  { %p1526_p13 = scmp.ne.s32.totalorder %s1857_s8, %s1525_s7  ;;  %p1529_p0 = scmp.lt.u32.totalorder %s1525_s7, %s1857_s8 }
 0x3ca   :  { %p1531_p1 = pnand %p1529_p0, %p1526_p13 }
 0x3cc   :  { %1534 = shalt.err (!%p1531_p1)
}
 0x3cd   :  { %1034 = dma.vmem_to_hbm [thread:$0]  %s1032_s28, 128, %s1857_s8, [#allocation16]  }
 0x3ce   :  { %1543 = dma.done.wait [#allocation4], 128  }
 0x3cf   :  { %1544 = vsyncadd [#allocation4], 4294967168 }
 0x3d0   :  { %1545 = dma.done.wait [#allocation16], 128  }
 0x3d1   :  { %1546 = vsyncadd [#allocation16], 4294967168 }
 0x3d2   :  { %1041 = vsyncpa [#allocation3], 1 }
 0x3d3   :  { %1042 = vsyncpa [#allocation6], 1 }
 0x3d4   :  { %1043 = vsyncpa [#allocation9], 1 }
 0x3d5   :  { %1044 = vsyncpa [#allocation12], 1 }
 0x3d6   :  { %1045 = vsyncpa [#allocation4], 1 }
 0x3d7   :  { %1046 = vsyncpa [#allocation16], 1 }

</bundles_post_ra>
